<compile_context>
chip_gen: v7x
topology: tpu7x:2x2x1
jax: 0.10.0
libtpu: 0.0.40
codegen_flags: <defaults>
</compile_context>

<pallas_src>
import functools

import jax
import jax.numpy as jnp
from jax.experimental import pallas as pl
from jax.experimental.pallas import tpu as pltpu


def _highway_kernel(v_ref, xw_ref, xc_ref, out_ref, *, group):
    L = xw_ref.shape[-1]
    xw = xw_ref[...].astype(jnp.float32)          # (tm, L) packed word rows
    xc = xc_ref[...].astype(jnp.float32)          # (tm, L) packed char rows
    vt = v_ref[0:1, :]                            # (1, L) tiled token gating vector (f32)
    vc = v_ref[1:2, :]                            # (1, L) tiled char  gating vector (f32)

    # x @ diag(v) @ M == (x * v) @ M: per-lane weighted score contributions on the VPU,
    # then a single 0/1 block-diagonal matmul reduces every `group`-lane segment to its
    # score difference s_w - s_c AND broadcasts it back across that segment's lanes, so
    # the output is written with full-width unmasked stores.
    y = xw * vt - xc * vc                         # (tm, L)

    if group == L:
        same = jnp.ones((L, L), jnp.float32)      # whole row is one logical group
    else:
        # `group` is a power of two here (divisor of 128): group id == lane & ~(group-1).
        r = jax.lax.broadcasted_iota(jnp.int32, (L, L), 0)
        c = jax.lax.broadcasted_iota(jnp.int32, (L, L), 1)
        gm = jnp.int32(~(group - 1))
        same = ((r & gm) == (c & gm)).astype(jnp.float32)

    d = jnp.dot(y, same, preferred_element_type=jnp.float32,
                precision=jax.lax.Precision.HIGHEST)

    # softmax([s_w, s_c]) over the 2-way axis == sigmoid(s_w - s_c) for the word gate.
    gate = jax.nn.sigmoid(d)                      # a_word; a_char = 1 - gate
    out_ref[...] = (xc + gate * (xw - xc)).astype(out_ref.dtype)


def _row_blocks_for_device():
    # v7x has 2 TensorCores per chip -> give each a parallel row block.  v5e/v6e have a
    # single TC where every extra grid step is ~0.35 us of pure overhead for ~0.2 us of DMA.
    try:
        kind = jax.devices()[0].device_kind.lower()
    except Exception:
        return 1
    return 2 if "v7" in kind else 1


@jax.jit
def char_highway_net(rep_word, rep_char, W, w_token, w_char):
    """rep_word, rep_char: (n, bsz, hsz).  W: (hsz,).  w_token / w_char: (hsz, hsz)
    PyTorch Linear weights ((out, in), bias-free)."""
    n, bsz, hsz = rep_word.shape
    M = n * bsz
    dtype = rep_word.dtype

    # Algebraic fusion: <x @ Wt.T, W> == <x, Wt.T @ W>  (Linear is bias-free).  Keep the
    # gating vectors in f32 so bf16 activations don't double-truncate the scores.
    v_tok = w_token.astype(jnp.float32).T @ W.astype(jnp.float32)    # (hsz,)
    v_chr = w_char.astype(jnp.float32).T @ W.astype(jnp.float32)     # (hsz,)

    xw = rep_word.reshape(M, hsz)
    xc = rep_char.reshape(M, hsz)

    # --- Lane-dense packing: G logical rows per 128-wide lane row ------------------------
    if hsz <= 128 and 128 % hsz == 0:
        packed = True
        G = 128 // hsz
        group, L = hsz, 128
        pad_rows = (-M) % G
        if pad_rows:                               # keep the unmasked-store path on any M
            xw = jnp.pad(xw, ((0, pad_rows), (0, 0)))
            xc = jnp.pad(xc, ((0, pad_rows), (0, 0)))
        Mp = (M + pad_rows) // G
        xw = xw.reshape(Mp, L)                     # row-major contiguous => free reshape
        xc = xc.reshape(Mp, L)
        vt = jnp.tile(v_tok, G)
        vc = jnp.tile(v_chr, G)
    else:
        # Generic hsz: pad the feature dim up to full 128-lane rows; one group per row.
        packed = False
        G = 1
        L = int(pl.cdiv(hsz, 128)) * 128
        group = L
        pad_rows = 0
        Mp = M
        xw = jnp.pad(xw, ((0, 0), (0, L - hsz)))
        xc = jnp.pad(xc, ((0, 0), (0, L - hsz)))
        vt = jnp.pad(v_tok, (0, L - hsz))
        vc = jnp.pad(v_chr, (0, L - hsz))

    # Tiny (8, L) gating slab (4 KB) instead of dense (L, L) A/B matrices (128 KB of HBM
    # reads in a kernel whose mandatory traffic is ~465 KB); the mask is rebuilt in-kernel.
    v_slab = jnp.zeros((8, L), jnp.float32).at[0].set(vt).at[1].set(vc)

    # --- Tiling: 1 block on single-TC chips, 2 "parallel" blocks on v7x ------------------
    blocks = max(1, min(_row_blocks_for_device(), int(pl.cdiv(Mp, 8))))
    if blocks == 1 or Mp < 16:
        tm = Mp                                    # one full-array block, zero raggedness
    else:
        tm = min(Mp, int(pl.cdiv(int(pl.cdiv(Mp, blocks)), 8)) * 8)
    grid = (int(pl.cdiv(Mp, tm)),)                 # ragged last block handled by Pallas

    kernel = functools.partial(_highway_kernel, group=group)

    out = pl.pallas_call(
        kernel,
        out_shape=jax.ShapeDtypeStruct((Mp, L), dtype),
        grid_spec=pltpu.PrefetchScalarGridSpec(
            num_scalar_prefetch=0,
            grid=grid,
            in_specs=[
                pl.BlockSpec((8, L), lambda i: (0, 0)),    # gating slab (resident)
                pl.BlockSpec((tm, L), lambda i: (i, 0)),   # packed word rows
                pl.BlockSpec((tm, L), lambda i: (i, 0)),   # packed char rows
            ],
            out_specs=pl.BlockSpec((tm, L), lambda i: (i, 0)),
        ),
        compiler_params=pltpu.CompilerParams(
            dimension_semantics=("parallel",),
        ),
    )(v_slab, xw, xc)

    if packed:
        out = out.reshape(Mp * G, hsz)
        if pad_rows:
            out = out[:M]
    else:
        out = out[:, :hsz]
    return out.reshape(n, bsz, hsz)


def _reference(rep_word, rep_char, W, w_token, w_char):
    f_w = jnp.einsum("nbh,oh->nbo", rep_word, w_token)
    f_c = jnp.einsum("nbh,oh->nbo", rep_char, w_char)
    s_w = jnp.sum(f_w * W, axis=-1, keepdims=True)
    s_c = jnp.sum(f_c * W, axis=-1, keepdims=True)
    attn = jax.nn.softmax(jnp.concatenate([s_w, s_c], axis=-1), axis=-1)
    return attn[..., 0:1] * rep_word + attn[..., 1:2] * rep_char


if __name__ == "__main__":
    # n = 606 matches the hard-coded repeat(606, ...) in the original module.
    n, bsz, hsz = 606, 2, 32

    key = jax.random.PRNGKey(0)
    k1, k2, k3, k4, k5 = jax.random.split(key, 5)
    rep_word = jax.random.normal(k1, (n, bsz, hsz), dtype=jnp.float32)
    rep_char = jax.random.normal(k2, (n, bsz, hsz), dtype=jnp.float32)
    # Module parameter shapes: W (hsz,), two Linear(hsz, hsz, bias=False) weights.
    W = jax.random.normal(k3, (hsz,), dtype=jnp.float32) * 0.1
    w_token = jax.random.normal(k4, (hsz, hsz), dtype=jnp.float32) * (1.0 / hsz ** 0.5)
    w_char = jax.random.normal(k5, (hsz, hsz), dtype=jnp.float32) * (1.0 / hsz ** 0.5)

    out = char_highway_net(rep_word, rep_char, W, w_token, w_char)
    out = jax.block_until_ready(out)

    ref = _reference(rep_word, rep_char, W, w_token, w_char)
    assert out.shape == (n, bsz, hsz)
    assert jnp.allclose(out, ref, rtol=1e-3, atol=1e-3), "mismatch vs reference"

    print("KERNEL_OK")
</pallas_src>

<mosaic_0001>
module attributes {stable_mosaic.version = 11 : i64} {
  func.func @_highway_kernel(%arg0: i32, %arg1: memref<8x128xf32, #tpu.memory_space<vmem>>, %arg2: memref<303x128xf32, #tpu.memory_space<vmem>>, %arg3: memref<303x128xf32, #tpu.memory_space<vmem>>, %arg4: memref<303x128xf32, #tpu.memory_space<vmem>>) attributes {dimension_semantics = [#tpu.dimension_semantics<parallel>], iteration_bounds = array<i64: 1>, scalar_prefetch = 0 : i64, scratch_operands = 0 : i64, tpu.core_type = #tpu.core_type<tc>, window_params = [{pipeline_mode = #tpu.pipeline_mode<synchronous>, transform_indices = @transform_0, window_bounds = array<i64: 8, 128>}, {transform_indices = @transform_1, window_bounds = array<i64: 303, 128>}, {transform_indices = @transform_2, window_bounds = array<i64: 303, 128>}, {transform_indices = @transform_3, window_bounds = array<i64: 303, 128>}]} {
    %c0 = arith.constant 0 : index
    %c0_0 = arith.constant 0 : index
    %0 = vector.load %arg2[%c0, %c0_0] : memref<303x128xf32, #tpu.memory_space<vmem>>, vector<303x128xf32>
    %c0_1 = arith.constant 0 : index
    %c0_2 = arith.constant 0 : index
    %1 = vector.load %arg3[%c0_1, %c0_2] : memref<303x128xf32, #tpu.memory_space<vmem>>, vector<303x128xf32>
    %c0_3 = arith.constant 0 : index
    %c0_4 = arith.constant 0 : index
    %2 = vector.load %arg1[%c0_3, %c0_4] : memref<8x128xf32, #tpu.memory_space<vmem>>, vector<1x128xf32>
    %c1 = arith.constant 1 : index
    %c0_5 = arith.constant 0 : index
    %3 = vector.load %arg1[%c1, %c0_5] : memref<8x128xf32, #tpu.memory_space<vmem>>, vector<1x128xf32>
    %4 = vector.broadcast %2 : vector<1x128xf32> to vector<303x128xf32>
    %5 = arith.mulf %0, %4 : vector<303x128xf32>
    %6 = vector.broadcast %3 : vector<1x128xf32> to vector<303x128xf32>
    %7 = arith.mulf %1, %6 : vector<303x128xf32>
    %8 = arith.subf %5, %7 : vector<303x128xf32>
    %9 = tpu.iota {dimensions = array<i32: 0>} : vector<128x128xi32>
    %10 = tpu.iota {dimensions = array<i32: 1>} : vector<128x128xi32>
    %c-32_i32 = arith.constant -32 : i32
    %11 = vector.broadcast %c-32_i32 : i32 to vector<128x128xi32>
    %12 = arith.andi %9, %11 : vector<128x128xi32>
    %c-32_i32_6 = arith.constant -32 : i32
    %13 = vector.broadcast %c-32_i32_6 : i32 to vector<128x128xi32>
    %14 = arith.andi %10, %13 : vector<128x128xi32>
    %15 = arith.cmpi eq, %12, %14 : vector<128x128xi32>
    %16 = arith.extui %15 : vector<128x128xi1> to vector<128x128xi32>
    %17 = arith.sitofp %16 : vector<128x128xi32> to vector<128x128xf32>
    %cst = arith.constant dense<0.000000e+00> : vector<303x128xf32>
    %18 = tpu.matmul %8, %17, %cst {dimension_numbers = #tpu.dot_dimension_numbers<[1], [0], [0], [1], [0, 0, 1, 1], [], []>, precision = #tpu.contract_precision<fp32>} : vector<303x128xf32>, vector<128x128xf32>, vector<303x128xf32> -> vector<303x128xf32>
    %19 = arith.negf %18 : vector<303x128xf32>
    %20 = math.exp %19 : vector<303x128xf32>
    %cst_7 = arith.constant 1.000000e+00 : f32
    %21 = vector.broadcast %cst_7 : f32 to vector<303x128xf32>
    %22 = arith.addf %21, %20 : vector<303x128xf32>
    %23 = arith.divf %21, %22 : vector<303x128xf32>
    %24 = arith.subf %0, %1 : vector<303x128xf32>
    %25 = arith.mulf %23, %24 : vector<303x128xf32>
    %26 = arith.addf %1, %25 : vector<303x128xf32>
    %c0_8 = arith.constant 0 : index
    %c0_9 = arith.constant 0 : index
    %27 = vector.load %arg4[%c0_8, %c0_9] : memref<303x128xf32, #tpu.memory_space<vmem>>, vector<303x128xf32>
    tpu.vector_store %arg4[%c0_8, %c0_9], %26 {strides = array<i32>} : memref<303x128xf32, #tpu.memory_space<vmem>>, vector<303x128xf32>,
    return
  }
  func.func @transform_0(%arg0: i32) -> (i32, i32) {
    %c0_i32 = arith.constant 0 : i32
    %c0_i32_0 = arith.constant 0 : i32
    %c0_i32_1 = arith.constant 0 : i32
    return %c0_i32, %c0_i32_0 : i32, i32
  }
  func.func @transform_1(%arg0: i32) -> (i32, i32) {
    %c0_i32 = arith.constant 0 : i32
    %c0_i32_0 = arith.constant 0 : i32
    return %arg0, %c0_i32 : i32, i32
  }
  func.func @transform_2(%arg0: i32) -> (i32, i32) {
    %c0_i32 = arith.constant 0 : i32
    %c0_i32_0 = arith.constant 0 : i32
    return %arg0, %c0_i32 : i32, i32
  }
  func.func @transform_3(%arg0: i32) -> (i32, i32) {
    %c0_i32 = arith.constant 0 : i32
    %c0_i32_0 = arith.constant 0 : i32
    return %arg0, %c0_i32 : i32, i32
  }
}

</mosaic_0001>

<bundles_post_ra>
// kernel: tile.18
= control target key start
LH: loop header
LB: loop body
LE: loop exit
PB: predicated region body
PF: predicated region fallthrough
CT: control target
= control target key end

     0   :  { %s22_s0 = inlined_call_operand.vmem [shape: f32[32], index: 0, kind: input, shape index: {}]   ;;  %s23_s1 = inlined_call_operand.vmem [shape: f32[4,32], index: 1, kind: output, shape index: {}]  }
   0x1   :  { %v4_v0 = vld [vmem:[%s22_s0] ss:$0 sm:$0xff] }
   0x2   :  { %5 = vst [vmem:[%s23_s1] sm:$0xf] %v4_v0 }

// kernel: char_highway_net.1
= control target key start
LH: loop header
LB: loop body
LE: loop exit
PB: predicated region body
PF: predicated region fallthrough
CT: control target
= control target key end

     0   :  { %v214_v0 = vlaneseq  ;;  %v6099_v22 = vmov 1.0|1.0   ;;  %v6191_v31 = vmov 0  ;;  %v6096_v42 = vmov 0.0   ;;  %s6090_s0 = inlined_call_operand.vmem [shape: f32[8,128], index: 0, kind: input, shape index: {}]   ;;  %s6091_s1 = inlined_call_operand.vmem [shape: f32[303,128], index: 1, kind: input, shape index: {}]   ;;  %s6092_s2 = inlined_call_operand.vmem [shape: f32[303,128], index: 2, kind: input, shape index: {}]   ;;  %s6093_s3 = inlined_call_operand.vmem [shape: f32[303,128], index: 3, kind: output, shape index: {}]  }
   0x1   :  { %v14_v29 = vld [vmem:[%s6091_s1] sm:$0xff]  ;;  %v15_v40 = vld [vmem:[%s6091_s1 + $0x8] sm:$0xff]  ;;  %v54_v24 = vld [vmem:[%s6092_s2 + $0x10] sm:$0xff] }
   0x2   :  { %v4512_v1 = vshrl.u32 %v214_v0, 7  ;;  %v232_v2 = vand.u32 127, %v214_v0  ;;  %v4595_v30 = vld [vmem:[%s6090_s0] ss:$0 sm:$0xff]  ;;  %v4624_v39 = vld [vmem:[%s6090_s0 + $0x1] ss:$0 sm:$0xff] }
   0x3   :  { %v52_v34 = vld [vmem:[%s6092_s2] sm:$0xff]  ;;  %v53_v41 = vld [vmem:[%s6092_s2 + $0x8] sm:$0xff]  ;;  %v96_v46 = vmul.f32 %v4595_v30, %v14_v29  ;;  %v97_v54 = vmul.f32 %v4595_v30, %v15_v40 }
   0x4   :  { %v216_v3 = vadd.s32 8, %v4512_v1  ;;  %v233_v4 = vand.u32 4294967264, %v4512_v1  ;;  %v4516_v5 = vand.u32 4294967264, %v232_v2  ;;  %v217_v6 = vadd.s32 16, %v4512_v1  ;;  %v18_v25 = vld [vmem:[%s6091_s1 + $0x20] sm:$0xff] }
   0x5   :  { %v218_v7 = vadd.s32 24, %v4512_v1  ;;  %v219_v8 = vadd.s32 32, %v4512_v1  ;;  %v220_v9 = vadd.s32 40, %v4512_v1  ;;  %v221_v13 = vadd.s32 48, %v4512_v1 }
   0x6   :  { %v234_v10 = vand.u32 4294967264, %v216_v3  ;;  %vm4523_vm0 = vcmp.eq.s32.totalorder %v233_v4, %v4516_v5  ;;  %v235_v12 = vand.u32 4294967264, %v217_v6  ;;  %v222_v17 = vadd.s32 56, %v4512_v1 }
   0x7   :  { %v236_v14 = vand.u32 4294967264, %v218_v7  ;;  %v237_v15 = vand.u32 4294967264, %v219_v8  ;;  %v238_v16 = vand.u32 4294967264, %v220_v9  ;;  %v239_v26 = vand.u32 4294967264, %v221_v13  ;;  %v16_v13 = vld [vmem:[%s6091_s1 + $0x10] sm:$0xff] }
   0x8   :  { %vm4530_vm1 = vcmp.eq.s32.totalorder %v234_v10, %v4516_v5  ;;  %vm4535_vm2 = vcmp.eq.s32.totalorder %v235_v12, %v4516_v5  ;;  %v240_v27 = vand.u32 4294967264, %v222_v17  ;;  %v223_v28 = vadd.s32 64, %v4512_v1  ;;  %v58_v12 = vld [vmem:[%s6092_s2 + $0x30] sm:$0xff] }
   0x9   :  { %vm4543_vm3 = vmpackc.low %vm4530_vm1, %vm4523_vm0  ;;  %vm4548_vm4 = vcmp.eq.s32.totalorder %v236_v14, %v4516_v5  ;;  %vm4567_vm6 = vcmp.eq.s32.totalorder %v237_v15, %v4516_v5  ;;  %vm4572_vm7 = vcmp.eq.s32.totalorder %v238_v16, %v4516_v5  ;;  %v224_v32 = vadd.s32 72, %v4512_v1 }
   0xa   :  { %3877 = vmatprep.subr.msk.bf16.mxu1 %vm4543_vm3, %v6099_v22  ;;  %3973 = vmatprep.subr.msk.bf16.mxu0 %vm4543_vm3, %v6099_v22  ;;  %vm4562_vm5 = vmpackc.low %vm4548_vm4, %vm4535_vm2  ;;  %v225_v33 = vadd.s32 80, %v4512_v1  ;;  %vm4611_vm9 = vcmp.eq.s32.totalorder %v239_v26, %v4516_v5  ;;  %vm4616_vm10 = vcmp.eq.s32.totalorder %v240_v27, %v4516_v5  ;;  %v241_v37 = vand.u32 4294967264, %v223_v28 }
   0xb   :  { %3879 = vmatpush3.bf16.msk.msra.mxu1 %vm4543_vm3, %v6099_v22  ;;  %3975 = vmatpush3.bf16.msk.msra.mxu0 %vm4543_vm3, %v6099_v22  ;;  %vm4601_vm8 = vmpackc.low %vm4572_vm7, %vm4567_vm6  ;;  %v226_v38 = vadd.s32 88, %v4512_v1  ;;  %v2916_v43 = vsel %vm4523_vm0, 1.0, %v6096_v42  ;;  %v242_v44 = vand.u32 4294967264, %v224_v32  ;;  %v227_v45 = vadd.s32 96, %v4512_v1 }
   0xc   :  { %3881 = vmatprep.subr.msk.bf16.mxu1 %vm4562_vm5, %v6099_v22  ;;  %3977 = vmatprep.subr.msk.bf16.mxu0 %vm4562_vm5, %v6099_v22  ;;  %v6192_v31 = vsel %vm4601_vm8, 4294967295, %v6191_v31  ;;  %v2917_v47 = vsel %vm4530_vm1, 1.0, %v6096_v42  ;;  %v243_v48 = vand.u32 4294967264, %v225_v33  ;;  %v228_v49 = vadd.s32 104, %v4512_v1  ;;  %vm4658_vm11 = vmpackc.low %vm4616_vm10, %vm4611_vm9  ;;  %v17_v33 = vld [vmem:[%s6091_s1 + $0x18] sm:$0xff] }
   0xd   :  { %v229_v50 = vadd.s32 112, %v4512_v1  ;;  %v245_v52 = vand.u32 4294967264, %v227_v45  ;;  %v138_v53 = vmul.f32 %v4624_v39, %v52_v34  ;;  %v139_v55 = vmul.f32 %v4624_v39, %v53_v41  ;;  %v55_v34 = vld [vmem:[%s6092_s2 + $0x18] sm:$0xff] }
   0xe   :  { %vm4666_vm12 = vcmp.eq.s32.totalorder %v241_v37, %v4516_v5  ;;  %vm4671_vm13 = vcmp.eq.s32.totalorder %v242_v44, %v4516_v5  ;;  %v244_v58 = vand.u32 4294967264, %v226_v38  ;;  %v4675_v59 = vsub.f32 %v2916_v43, %v2916_v43 }
   0xf   :  { %3883 = vmatpush3.bf16.msk.msra.mxu1 %vm4562_vm5, %v6099_v22  ;;  %3979 = vmatpush3.bf16.msk.msra.mxu0 %vm4562_vm5, %v6099_v22  ;;  %v4677_v60 = vsub.f32 %v2917_v47, %v2917_v47  ;;  %v2918_v61 = vsel %vm4535_vm2, 1.0, %v6096_v42  ;;  %v246_v62 = vand.u32 4294967264, %v228_v49  ;;  %vm4695_vm14 = vcmp.eq.s32.totalorder %v243_v48, %v4516_v5  ;;  %vm4709_vm0 = vmpackc.low %vm4671_vm13, %vm4666_vm12 }
  0x10   :  { %3885 = vmatprep.subr.msk.bf16.mxu1 %vm4601_vm8, %v6099_v22  ;;  %3981 = vmatprep.subr.msk.bf16.mxu0 %vm4601_vm8, %v6099_v22  ;;  %vm4700_vm15 = vcmp.eq.s32.totalorder %v245_v52, %v4516_v5  ;;  %v230_v2 = vadd.s32 120, %v4512_v1  ;;  %v247_v3 = vand.u32 4294967264, %v229_v50  ;;  %v176_v1 = vsub.f32 %v96_v46, %v138_v53  ;;  %v56_v46 = vld [vmem:[%s6092_s2 + $0x20] sm:$0xff] }
  0x11   :  { %vm4714_vm1 = vcmp.eq.s32.totalorder %v246_v62, %v4516_v5  ;;  %v4721_v7 = vsel %vm4700_vm15, 1.0, %v6096_v42  ;;  %v177_v8 = vsub.f32 %v97_v54, %v139_v55  ;;  %vm4724_vm2 = vcmp.eq.s32.totalorder %v244_v58, %v4516_v5  ;;  %v19_v58 = vld [vmem:[%s6091_s1 + $0x28] sm:$0xff] }
  0x12   :  { %v4731_v10 = vsel %vm4714_vm1, 1.0, %v6096_v42  ;;  %v248_v11 = vand.u32 4294967264, %v230_v2  ;;  %v2919_v14 = vsel %vm4548_vm4, 1.0, %v6096_v42  ;;  %v4755_v16 = vand.u32 4294901760, %v176_v1 }
  0x13   :  { %3887 = vmatpush3.bf16.msk.msra.mxu1 %vm4601_vm8, %v6099_v22  ;;  %3983 = vmatpush3.bf16.msk.msra.mxu0 %vm4601_vm8, %v6099_v22  ;;  %vm4734_vm8 = vcmp.eq.s32.totalorder %v247_v3, %v4516_v5  ;;  %v4757_v17 = vand.u32 4294901760, %v177_v8  ;;  %v2920_v18 = vsel %vm4567_vm6, 1.0, %v6096_v42  ;;  %v762_v21 = vand.u32 4294901760, %v4675_v59  ;;  %vm4782_vm6 = vmpackc.low %vm4724_vm2, %vm4695_vm14 }
  0x14   :  { %3889 = vmatprep.subr.msk.bf16.mxu1 %vm4658_vm11, %v6099_v22  ;;  %3985 = vmatprep.subr.msk.bf16.mxu0 %vm4658_vm11, %v6099_v22  ;;  %v4753_v15 = vsel %vm4734_vm8, 1.0, %v6096_v42  ;;  %vm4769_vm4 = vcmp.eq.s32.totalorder %v248_v11, %v4516_v5  ;;  %v769_v26 = vand.u32 4294901760, %v4677_v60  ;;  %v4792_v28 = vsub.f32 %v176_v1, %v4755_v16 }
  0x15   :  { %v4789_v5 = vsel %vm4769_vm4, 1.0, %v6096_v42  ;;  %v4795_v29 = vsub.f32 %v177_v8, %v4757_v17  ;;  %v98_v32 = vmul.f32 %v4595_v30, %v16_v13  ;;  %v4804_v37 = vsub.f32 %v2918_v61, %v2918_v61  ;;  %v57_v61 = vld [vmem:[%s6092_s2 + $0x28] sm:$0xff]  ;;  %v20_v13 = vld [vmem:[%s6091_s1 + $0x30] sm:$0xff] }
  0x16   :  { %6219 = vst [vmem:[#allocation2_spill] sm:$0xff] %v4792_v28  ;;  %v4806_v38 = vsub.f32 %v2919_v14, %v2919_v14  ;;  %v2921_v40 = vsel %vm4572_vm7, 1.0, %v6096_v42  ;;  %v381_v41 = vand.u32 4294901760, %v4792_v28  ;;  %v763_v43 = vsub.f32 %v4675_v59, %v762_v21  ;;  %vm4843_vm7 = vmpackc.low %vm4714_vm1, %vm4700_vm15 }
  0x17   :  { %3891 = vmatpush3.bf16.msk.msra.mxu1 %vm4658_vm11, %v6099_v22  ;;  %3987 = vmatpush3.bf16.msk.msra.mxu0 %vm4658_vm11, %v6099_v22  ;;  %6220 = vst [vmem:[#allocation3_spill] sm:$0xff] %v4795_v29  ;;  %v770_v44 = vsub.f32 %v4677_v60, %v769_v26  ;;  %v140_v45 = vmul.f32 %v4624_v39, %v54_v24  ;;  %v6098_v54 = vand.u32 4294901760, %v4795_v29  ;;  %vm4884_vm15 = vmpackc.low %vm4769_vm4, %vm4734_vm8  ;;  %v6223_v24 = vmov 0 }
  0x18   :  { %3893 = vmatprep.subr.msk.bf16.mxu1 %vm4709_vm0, %v6099_v22  ;;  %3989 = vmatprep.subr.msk.bf16.mxu0 %vm4709_vm0, %v6099_v22  ;;  %v4827_v47 = vsub.f32 %v2920_v18, %v2920_v18  ;;  %v99_v48 = vmul.f32 %v4595_v30, %v17_v33  ;;  %v141_v49 = vmul.f32 %v4624_v39, %v55_v34  ;;  %v764_v1 = vand.u32 4294901760, %v763_v43 }
  0x19   :  { %v4837_v50 = vsub.f32 %v2921_v40, %v2921_v40  ;;  %v382_v53 = vsub.f32 %v4792_v28, %v381_v41  ;;  %3641 = vmatprep.mubr.f32.mxu0 %v381_v41  ;;  %v178_v55 = vsub.f32 %v98_v32, %v140_v45  ;;  %v4855_v62 = vpack.c.bf16 %v769_v26, %v762_v21 }
  0x1a   :  { %v179_v0 = vsub.f32 %v99_v48, %v141_v49  ;;  %v100_v2 = vmul.f32 %v4595_v30, %v18_v25  ;;  %v142_v3 = vmul.f32 %v4624_v39, %v56_v46  ;;  %v771_v8 = vand.u32 4294901760, %v770_v44 }
  0x1b   :  { %3895 = vmatpush3.bf16.msk.msra.mxu1 %vm4709_vm0, %v6099_v22  ;;  %3991 = vmatpush3.bf16.msk.msra.mxu0 %vm4709_vm0, %v6099_v22  ;;  %v383_v6 = vand.u32 4294901760, %v382_v53  ;;  %v4865_v11 = vand.u32 4294901760, %v178_v55  ;;  %v101_v21 = vmul.f32 %v4595_v30, %v19_v58  ;;  %v143_v26 = vmul.f32 %v4624_v39, %v57_v61  ;;  %v21_v61 = vld [vmem:[%s6091_s1 + $0x38] sm:$0xff] }
  0x1c   :  { %3897 = vmatprep.subr.msk.bf16.mxu1 %vm4782_vm6, %v6099_v22  ;;  %3993 = vmatprep.subr.msk.bf16.mxu0 %vm4782_vm6, %v6099_v22  ;;  %v4876_v14 = vand.u32 4294901760, %v179_v0  ;;  %v180_v18 = vsub.f32 %v100_v2, %v142_v3  ;;  %v6224_v24 = vsel %vm4884_vm15, 4294967295, %v6223_v24  ;;  %v392_v32 = vsub.f32 %v4795_v29, %v6098_v54  ;;  %v23_v54 = vld [vmem:[%s6091_s1 + $0x48] sm:$0xff] }
  0x1d   :  { %6225 = vst [vmem:[#allocation4_spill] sm:$0xff] %v6224_v24  ;;  %3374 = vmatprep.mubr.f32.mxu1 %v383_v6  ;;  %v4892_v33 = vsub.f32 %v178_v55, %v4865_v11  ;;  %v776_v34 = vand.u32 4294901760, %v4804_v37  ;;  %v783_v40 = vand.u32 4294901760, %v4806_v38  ;;  %v181_v43 = vsub.f32 %v101_v21, %v143_v26  ;;  %v22_v26 = vld [vmem:[%s6091_s1 + $0x40] sm:$0xff] }
  0x1e   :  { %v4900_v19 = vsub.f32 %v179_v0, %v4876_v14  ;;  %v4902_v41 = vand.u32 4294901760, %v180_v18  ;;  %v102_v44 = vmul.f32 %v4595_v30, %v20_v13  ;;  %v3908_v45 = vpack.c.bf16 %v771_v8, %v764_v1  ;;  %v59_v0 = vld [vmem:[%s6092_s2 + $0x38] sm:$0xff] }
  0x1f   :  { %3899 = vmatpush3.bf16.msk.msra.mxu1 %vm4782_vm6, %v6099_v22  ;;  %3995 = vmatpush3.bf16.msk.msra.mxu0 %vm4782_vm6, %v6099_v22  ;;  %6226 = vst [vmem:[#allocation5_spill] sm:$0xff] %v4892_v33  ;;  %v401_v25 = vand.u32 4294901760, %v4892_v33  ;;  %v777_v46 = vsub.f32 %v4804_v37, %v776_v34  ;;  %v784_v48 = vsub.f32 %v4806_v38, %v783_v40  ;;  %v4924_v55 = vand.u32 4294901760, %v181_v43 }
  0x20   :  { %3901 = vmatprep.subr.msk.bf16.mxu1 %vm4843_vm7, %v6099_v22  ;;  %3997 = vmatprep.subr.msk.bf16.mxu0 %vm4843_vm7, %v6099_v22  ;;  %6227 = vst [vmem:[#allocation6_spill] sm:$0xff] %v4900_v19  ;;  %v411_v49 = vand.u32 4294901760, %v4900_v19  ;;  %v4922_v53 = vsub.f32 %v180_v18, %v4902_v41  ;;  %v144_v58 = vmul.f32 %v4624_v39, %v58_v12  ;;  %v393_v2 = vand.u32 4294901760, %v392_v32  ;;  %v60_v32 = vld [vmem:[%s6092_s2 + $0x40] sm:$0xff] }
  0x21   :  { %v402_v3 = vsub.f32 %v4892_v33, %v401_v25  ;;  %v778_v6 = vand.u32 4294901760, %v777_v46  ;;  %v785_v1 = vand.u32 4294901760, %v784_v48  ;;  %v4937_v18 = vsub.f32 %v181_v43, %v4924_v55 }
  0x22   :  { %6228 = vst [vmem:[#allocation7_spill] sm:$0xff] %v4922_v53  ;;  %v412_v8 = vsub.f32 %v4900_v19, %v411_v49  ;;  %v421_v13 = vand.u32 4294901760, %v4922_v53  ;;  %v182_v21 = vsub.f32 %v102_v44, %v144_v58  ;;  %v4008_v12 = vpack.c.bf16 %v783_v40, %v776_v34  ;;  %v61_v34 = vld [vmem:[%s6092_s2 + $0x48] sm:$0xff] }
  0x23   :  { %3903 = vmatpush3.bf16.msk.msra.mxu1 %vm4843_vm7, %v6099_v22  ;;  %3999 = vmatpush3.bf16.msk.msra.mxu0 %vm4843_vm7, %v6099_v22  ;;  %6229 = vst [vmem:[#allocation8_spill] sm:$0xff] %v4937_v18  ;;  %v103_v43 = vmul.f32 %v4595_v30, %v21_v61  ;;  %v145_v44 = vmul.f32 %v4624_v39, %v59_v0  ;;  %v403_v46 = vand.u32 4294901760, %v402_v3  ;;  %v431_v58 = vand.u32 4294901760, %v4937_v18 }
  0x24   :  { %3905 = vmatprep.subr.msk.bf16.mxu1 %vm4884_vm15, %v6099_v22  ;;  %4001 = vmatprep.subr.msk.bf16.mxu0 %vm4884_vm15, %v6099_v22  ;;  %v422_v48 = vsub.f32 %v4922_v53, %v421_v13  ;;  %v4956_v42 = vand.u32 4294901760, %v182_v21  ;;  %v3912_v40 = vpack.c.bf16 %v785_v1, %v778_v6  ;;  %v104_v0 = vmul.f32 %v4595_v30, %v22_v26  ;;  %v62_v6 = vld [vmem:[%s6092_s2 + $0x50] sm:$0xff] }
  0x25   :  { %v183_v61 = vsub.f32 %v103_v43, %v145_v44  ;;  %v146_v3 = vmul.f32 %v4624_v39, %v60_v32  ;;  %v6230_v53 = vand.u32 4294901760, %v4795_v29  ;;  %v413_v19 = vand.u32 4294901760, %v412_v8  ;;  %v33_v29 = vld [vmem:[%s6091_s1 + $0x98] sm:$0xff] }
  0x26   :  { %v423_v33 = vand.u32 4294901760, %v422_v48  ;;  %v432_v28 = vsub.f32 %v4937_v18, %v431_v58  ;;  %v4973_v24 = vsub.f32 %v182_v21, %v4956_v42  ;;  %v105_v26 = vmul.f32 %v4595_v30, %v23_v54 }
  0x27   :  { %3907 = vmatpush3.bf16.msk.msra.mxu1 %vm4884_vm15, %v6099_v22  ;;  %4003 = vmatpush3.bf16.msk.msra.mxu0 %vm4884_vm15, %v6099_v22  ;;  %v24_v22 = vld [vmem:[%s6091_s1 + $0x50] sm:$0xff]  ;;  %v4979_v1 = vand.u32 4294901760, %v183_v61  ;;  %v6232_v8 = vmov 0.0   ;;  %v148_v35 = vmul.f32 %v4624_v39, %v62_v6  ;;  %v797_v48 = vand.u32 4294901760, %v4837_v50 }
  0x28   :  { %3909 = vmatprep.subr.bf16.mxu1 %v3908_v45  ;;  %4005 = vmatprep.subr.bf16.mxu0 %v4855_v62  ;;  %6231 = vst [vmem:[#allocation9_spill] sm:$0xff] %v4973_v24  ;;  %v2922_v32 = vsel %vm4611_vm9, 1.0, %v6232_v8  ;;  %v2923_v21 = vsel %vm4616_vm10, 1.0, %v6232_v8  ;;  %v433_v36 = vand.u32 4294901760, %v432_v28  ;;  %v25_v28 = vld [vmem:[%s6091_s1 + $0x58] sm:$0xff]  ;;  %v3948_v20 = vpack.c.bf16 %v4837_v50, %v4827_v47 }
  0x29   :  { %v4992_v54 = vsub.f32 %v183_v61, %v4979_v1 }
  0x2a   :  { %3375 = vmatmul.mubr.f32.vlgmr.msra.gmra.mrb[0].mxu1 %v393_v2  ;;  %3642 = vmatmul.mubr.f32.vlgmr.msra.gmra.mrb[0].mxu0 %v6230_v53  ;;  %v184_v2 = vsub.f32 %v104_v0, %v146_v3  ;;  %v147_v53 = vmul.f32 %v4624_v39, %v61_v34 }
  0x2b   :  { %3911 = vmatpush3.bf16.msra.mxu1 %v3908_v45  ;;  %4007 = vmatpush3.bf16.msra.mxu0 %v4855_v62  ;;  %v441_v45 = vand.u32 4294901760, %v4973_v24  ;;  %v106_v62 = vmul.f32 %v4595_v30, %v24_v22  ;;  %6233 = vst [vmem:[#allocation10_spill] sm:$0xff] %v4992_v54  ;;  %v451_v22 = vand.u32 4294901760, %v4992_v54 }
  0x2c   :  { %3377 = vmatprep.mubr.f32.mxu1 %v403_v46  ;;  %3644 = vmatprep.mubr.f32.mxu0 %v401_v25  ;;  %v4994_v43 = vand.u32 4294901760, %v184_v2  ;;  %v185_v44 = vsub.f32 %v105_v26, %v147_v53  ;;  %v790_v25 = vand.u32 4294901760, %v4827_v47 }
  0x2d   :  { %3913 = vmatprep.subr.bf16.mxu1 %v3912_v40  ;;  %4009 = vmatprep.subr.bf16.mxu0 %v4008_v12  ;;  %v442_v46 = vsub.f32 %v4973_v24, %v441_v45  ;;  %v186_v0 = vsub.f32 %v106_v62, %v148_v35  ;;  %v452_v6 = vsub.f32 %v4992_v54, %v451_v22  ;;  %v26_v62 = vld [vmem:[%s6091_s1 + $0x60] sm:$0xff]  ;;  %v28_v24 = vld [vmem:[%s6091_s1 + $0x70] sm:$0xff] }
  0x2e   :  { %3378 = vmatmul.mubr.f32.gmra.mrb[2].mxu1 %v413_v19  ;;  %3645 = vmatmul.mubr.f32.gmra.mrb[2].mxu0 %v411_v49  ;;  %v5002_v34 = vsub.f32 %v184_v2, %v4994_v43  ;;  %v5004_v61 = vand.u32 4294901760, %v185_v44  ;;  %v63_v19 = vld [vmem:[%s6092_s2 + $0x58] sm:$0xff]  ;;  %v4012_v3 = vpack.c.bf16 %v797_v48, %v790_v25  ;;  %v107_v35 = vmul.f32 %v4595_v30, %v25_v28  ;;  %v65_v28 = vld [vmem:[%s6092_s2 + $0x68] sm:$0xff] }
  0x2f   :  { %3380 = vmatprep.mubr.f32.mxu1 %v423_v33  ;;  %3647 = vmatprep.mubr.f32.mxu0 %v421_v13  ;;  %v443_v49 = vand.u32 4294901760, %v442_v46  ;;  %v791_v33 = vsub.f32 %v4827_v47, %v790_v25  ;;  %v798_v13 = vsub.f32 %v4837_v50, %v797_v48  ;;  %v5019_v53 = vand.u32 4294901760, %v186_v0  ;;  %v64_v25 = vld [vmem:[%s6092_s2 + $0x60] sm:$0xff] }
  0x30   :  { %6234 = vst [vmem:[#allocation11_spill] sm:$0xff] %v5002_v34  ;;  %3915 = vmatpush3.bf16.msra.mxu1 %v3912_v40  ;;  %4011 = vmatpush3.bf16.msra.mxu0 %v4008_v12  ;;  %v461_v2 = vand.u32 4294901760, %v5002_v34  ;;  %v5017_v26 = vsub.f32 %v185_v44, %v5004_v61  ;;  %v149_v46 = vmul.f32 %v4624_v39, %v63_v19  ;;  %v453_v44 = vand.u32 4294901760, %v452_v6 }
  0x31   :  { %v792_v12 = vand.u32 4294901760, %v791_v33  ;;  %v799_v40 = vand.u32 4294901760, %v798_v13  ;;  %v5040_v19 = vsub.f32 %v2922_v32, %v2922_v32  ;;  %4013 = vmatprep.subr.bf16.mxu0 %v4012_v3  ;;  %v108_v33 = vmul.f32 %v4595_v30, %v26_v62  ;;  %v66_v32 = vld [vmem:[%s6092_s2 + $0x70] sm:$0xff] }
  0x32   :  { %6235 = vst [vmem:[#allocation12_spill] sm:$0xff] %v5017_v26  ;;  %3381 = vmatmul.mubr.f32.gmra.mrb[4].mxu1 %v433_v36  ;;  %3648 = vmatmul.mubr.f32.gmra.mrb[4].mxu0 %v431_v58  ;;  %v462_v48 = vsub.f32 %v5002_v34, %v461_v2  ;;  %v471_v54 = vand.u32 4294901760, %v5017_v26  ;;  %v5032_v36 = vsub.f32 %v186_v0, %v5019_v53  ;;  %v27_v58 = vld [vmem:[%s6091_s1 + $0x68] sm:$0xff] }
  0x33   :  { %3383 = vmatprep.mubr.f32.mxu1 %v443_v49  ;;  %3650 = vmatprep.mubr.f32.mxu0 %v441_v45  ;;  %v3916_v49 = vpack.c.bf16 %v799_v40, %v792_v12  ;;  %v187_v45 = vsub.f32 %v107_v35, %v149_v46  ;;  %v150_v34 = vmul.f32 %v4624_v39, %v64_v25  ;;  %v29_v35 = vld [vmem:[%s6091_s1 + $0x78] sm:$0xff]  ;;  %v2924_v46 = vsel %vm4666_vm12, 1.0, %v6232_v8 }
  0x34   :  { %6236 = vst [vmem:[#allocation13_spill] sm:$0xff] %v5032_v36  ;;  %v463_v13 = vand.u32 4294901760, %v462_v48  ;;  %v472_v6 = vsub.f32 %v5017_v26, %v471_v54  ;;  %v481_v0 = vand.u32 4294901760, %v5032_v36  ;;  %4015 = vmatpush3.bf16.msra.mxu0 %v4012_v3  ;;  %v5052_v12 = vsub.f32 %v2923_v21, %v2923_v21 }
  0x35   :  { %v5054_v62 = vand.u32 4294901760, %v187_v45  ;;  %v109_v40 = vmul.f32 %v4595_v30, %v27_v58  ;;  %v151_v3 = vmul.f32 %v4624_v39, %v65_v28  ;;  %3917 = vmatprep.subr.bf16.mxu1 %v3916_v49  ;;  %v110_v28 = vmul.f32 %v4595_v30, %v28_v24 }
  0x36   :  { %3384 = vmatmul.mubr.f32.gmra.mrb[6].mxu1 %v453_v44  ;;  %3651 = vmatmul.mubr.f32.gmra.mrb[6].mxu0 %v451_v22  ;;  %v473_v21 = vand.u32 4294901760, %v472_v6  ;;  %v482_v25 = vsub.f32 %v5032_v36, %v481_v0  ;;  %v188_v22 = vsub.f32 %v108_v33, %v150_v34  ;;  %v67_v44 = vld [vmem:[%s6092_s2 + $0x78] sm:$0xff]  ;;  %v152_v56 = vmul.f32 %v4624_v39, %v66_v32 }
  0x37   :  { %3386 = vmatprep.mubr.f32.mxu1 %v463_v13  ;;  %3653 = vmatprep.mubr.f32.mxu0 %v461_v2  ;;  %v5069_v48 = vsub.f32 %v187_v45, %v5054_v62  ;;  %v189_v58 = vsub.f32 %v109_v40, %v151_v3  ;;  %v2925_v2 = vsel %vm4671_vm13, 1.0, %v6232_v8  ;;  %v111_v33 = vmul.f32 %v4595_v30, %v29_v35 }
  0x38   :  { %v483_v13 = vand.u32 4294901760, %v482_v25  ;;  %3919 = vmatpush3.bf16.msra.mxu1 %v3916_v49  ;;  %v5076_v34 = vand.u32 4294901760, %v188_v22  ;;  %v190_v40 = vsub.f32 %v110_v28, %v152_v56  ;;  %v153_v24 = vmul.f32 %v4624_v39, %v67_v44  ;;  %v68_v56 = vld [vmem:[%s6092_s2 + $0x80] sm:$0xff] }
  0x39   :  { %6237 = vst [vmem:[#allocation14_spill] sm:$0xff] %v5069_v48  ;;  %v491_v45 = vand.u32 4294901760, %v5069_v48  ;;  %v5080_v6 = vand.u32 4294901760, %v189_v58  ;;  %v5083_v32 = vsub.f32 %v2924_v46, %v2924_v46  ;;  %v804_v49 = vand.u32 4294901760, %v5040_v19  ;;  %v30_v46 = vld [vmem:[%s6091_s1 + $0x80] sm:$0xff] }
  0x3a   :  { %3387 = vmatmul.mubr.f32.gmra.mrb[8].mxu1 %v473_v21  ;;  %3654 = vmatmul.mubr.f32.gmra.mrb[8].mxu0 %v471_v54  ;;  %v5086_v57 = vsub.f32 %v188_v22, %v5076_v34  ;;  %v811_v3 = vand.u32 4294901760, %v5052_v12  ;;  %v5094_v21 = vand.u32 4294901760, %v190_v40  ;;  %v191_v25 = vsub.f32 %v111_v33, %v153_v24 }
  0x3b   :  { %3389 = vmatprep.mubr.f32.mxu1 %v483_v13  ;;  %3656 = vmatprep.mubr.f32.mxu0 %v481_v0  ;;  %v492_v54 = vsub.f32 %v5069_v48, %v491_v45  ;;  %v5092_v35 = vsub.f32 %v189_v58, %v5080_v6  ;;  %v805_v22 = vsub.f32 %v5040_v19, %v804_v49  ;;  %v31_v48 = vld [vmem:[%s6091_s1 + $0x88] sm:$0xff] }
  0x3c   :  { %6238 = vst [vmem:[#allocation15_spill] sm:$0xff] %v5086_v57  ;;  %v501_v0 = vand.u32 4294901760, %v5086_v57  ;;  %v812_v44 = vsub.f32 %v5052_v12, %v811_v3  ;;  %v4016_v28 = vpack.c.bf16 %v811_v3, %v804_v49  ;;  %v5107_v33 = vsub.f32 %v190_v40, %v5094_v21 }
  0x3d   :  { %6239 = vst [vmem:[#allocation16_spill] sm:$0xff] %v5092_v35  ;;  %v493_v58 = vand.u32 4294901760, %v492_v54  ;;  %v511_v13 = vand.u32 4294901760, %v5092_v35  ;;  %v5109_v24 = vand.u32 4294901760, %v191_v25  ;;  %v806_v49 = vand.u32 4294901760, %v805_v22  ;;  %v32_v22 = vld [vmem:[%s6091_s1 + $0x90] sm:$0xff] }
  0x3e   :  { %3657 = vmatmul.mubr.f32.gmra.mrb[10].mxu0 %v491_v45  ;;  %6240 = vst [vmem:[#allocation17_spill] sm:$0xff] %v5107_v33  ;;  %v502_v36 = vsub.f32 %v5086_v57, %v501_v0  ;;  %v813_v3 = vand.u32 4294901760, %v812_v44  ;;  %4017 = vmatprep.subr.bf16.mxu0 %v4016_v28  ;;  %v112_v54 = vmul.f32 %v4595_v30, %v30_v46  ;;  %v521_v40 = vand.u32 4294901760, %v5107_v33 }
  0x3f   :  { %6241 = vst [vmem:[#allocation18_spill] sm:$0xff] %v5109_v24  ;;  %3659 = vmatprep.mubr.f32.mxu0 %v501_v0  ;;  %3390 = vmatmul.mubr.f32.gmra.mrb[10].mxu1 %v493_v58  ;;  %v512_v45 = vsub.f32 %v5092_v35, %v511_v13  ;;  %v5119_v26 = vsub.f32 %v191_v25, %v5109_v24  ;;  %v69_v0 = vld [vmem:[%s6092_s2 + $0x88] sm:$0xff]  ;;  %v70_v25 = vld [vmem:[%s6092_s2 + $0x90] sm:$0xff] }
  0x40   :  { %4019 = vmatpush3.bf16.msra.mxu0 %v4016_v28  ;;  %v154_v18 = vmul.f32 %v4624_v39, %v68_v56  ;;  %v503_v46 = vand.u32 4294901760, %v502_v36  ;;  %v3920_v44 = vpack.c.bf16 %v813_v3, %v806_v49  ;;  %v113_v58 = vmul.f32 %v4595_v30, %v31_v48  ;;  %v71_v36 = vld [vmem:[%s6092_s2 + $0x98] sm:$0xff] }
  0x41   :  { %6242 = vst [vmem:[#allocation19_spill] sm:$0xff] %v5119_v26  ;;  %v513_v35 = vand.u32 4294901760, %v512_v45  ;;  %v522_v28 = vsub.f32 %v5107_v33, %v521_v40  ;;  %v531_v56 = vand.u32 4294901760, %v5119_v26  ;;  %v5140_v48 = vsub.f32 %v2925_v2, %v2925_v2 }
  0x42   :  { %3660 = vmatmul.mubr.f32.gmra.mrb[12].mxu0 %v511_v13  ;;  %v192_v57 = vsub.f32 %v112_v54, %v154_v18  ;;  %3392 = vmatprep.mubr.f32.mxu1 %v503_v46  ;;  %v155_v49 = vmul.f32 %v4624_v39, %v69_v0  ;;  %v114_v13 = vmul.f32 %v4595_v30, %v32_v22  ;;  %v818_v3 = vand.u32 4294901760, %v5083_v32  ;;  %v72_v46 = vld [vmem:[%s6092_s2 + $0xa0] sm:$0xff] }
  0x43   :  { %3662 = vmatprep.mubr.f32.mxu0 %v521_v40  ;;  %3393 = vmatmul.mubr.f32.gmra.mrb[12].mxu1 %v513_v35  ;;  %v523_v18 = vand.u32 4294901760, %v522_v28  ;;  %v532_v54 = vsub.f32 %v5119_v26, %v531_v56  ;;  %v156_v33 = vmul.f32 %v4624_v39, %v70_v25  ;;  %v2926_v2 = vsel %vm4695_vm14, 1.0, %v6232_v8  ;;  %v34_v35 = vld [vmem:[%s6091_s1 + $0xa0] sm:$0xff] }
  0x44   :  { %3921 = vmatprep.subr.bf16.mxu1 %v3920_v44  ;;  %v5146_v45 = vand.u32 4294901760, %v192_v57  ;;  %v193_v40 = vsub.f32 %v113_v58, %v155_v49  ;;  %v115_v0 = vmul.f32 %v4595_v30, %v33_v29  ;;  %v157_v22 = vmul.f32 %v4624_v39, %v71_v36 }
  0x45   :  { %3923 = vmatpush3.bf16.msra.mxu1 %v3920_v44  ;;  %v2927_v25 = vsel %vm4724_vm2, 1.0, %v6232_v8  ;;  %3395 = vmatprep.mubr.f32.mxu1 %v523_v18  ;;  %v533_v63 = vand.u32 4294901760, %v532_v54  ;;  %v194_v29 = vsub.f32 %v114_v13, %v156_v33  ;;  %v819_v36 = vsub.f32 %v5083_v32, %v818_v3  ;;  %v35_v18 = vld [vmem:[%s6091_s1 + $0xa8] sm:$0xff] }
  0x46   :  { %6243 = vst [vmem:[#allocation20_spill] sm:$0xff] %v5146_v45  ;;  %3663 = vmatmul.mubr.f32.gmra.mrb[14].mxu0 %v531_v56  ;;  %v5164_v44 = vsub.f32 %v192_v57, %v5146_v45  ;;  %v5166_v58 = vand.u32 4294901760, %v193_v40  ;;  %v195_v28 = vsub.f32 %v115_v0, %v157_v22  ;;  %v825_v49 = vand.u32 4294901760, %v5140_v48  ;;  %v6280_v23 = vld [vmem:[#allocation18_spill] sm:$0xff] }
  0x47   :  { %3396 = vmatmul.mubr.f32.gmra.mrb[14].mxu1 %v533_v63  ;;  %v5171_v24 = vand.u32 4294901760, %v194_v29  ;;  %v116_v9 = vmul.f32 %v4595_v30, %v34_v35  ;;  %v158_v8 = vmul.f32 %v4624_v39, %v72_v46  ;;  %v820_v56 = vand.u32 4294901760, %v819_v36 }
  0x48   :  { %6244 = vst [vmem:[#allocation21_spill] sm:$0xff] %v5164_v44  ;;  %6245 = vst [vmem:[#allocation22_spill] sm:$0xff] %v5166_v58  ;;  %v541_v26 = vand.u32 4294901760, %v5164_v44  ;;  %v5176_v57 = vsub.f32 %v193_v40, %v5166_v58  ;;  %v5178_v33 = vand.u32 4294901760, %v195_v28  ;;  %v826_v13 = vsub.f32 %v5140_v48, %v825_v49  ;;  %v73_v40 = vld [vmem:[%s6092_s2 + $0xa8] sm:$0xff] }
  0x49   :  { %6246 = vst [vmem:[#allocation23_spill] sm:$0xff] %v5171_v24  ;;  %v5186_v0 = vsub.f32 %v194_v29, %v5171_v24  ;;  %v4020_v22 = vpack.c.bf16 %v825_v49, %v818_v3  ;;  %v196_v35 = vsub.f32 %v116_v9, %v158_v8  ;;  %v5191_v46 = vsub.f32 %v2926_v2, %v2926_v2  ;;  %v36_v49 = vld [vmem:[%s6091_s1 + $0xb0] sm:$0xff] }
  0x4a   :  { %6247 = vst [vmem:[#allocation24_spill] sm:$0xff] %v5176_v57  ;;  %6248 = vst [vmem:[#allocation25_spill] sm:$0xff] %v5178_v33  ;;  %v542_v54 = vsub.f32 %v5164_v44, %v541_v26  ;;  %3665 = vmatprep.mubr.f32.mxu0 %v541_v26  ;;  %v551_v63 = vand.u32 4294901760, %v5176_v57  ;;  %v5195_v36 = vsub.f32 %v195_v28, %v5178_v33  ;;  %v827_v58 = vand.u32 4294901760, %v826_v13  ;;  %v74_v13 = vld [vmem:[%s6092_s2 + $0xb0] sm:$0xff] }
  0x4b   :  { %6249 = vst [vmem:[#allocation26_spill] sm:$0xff] %v5186_v0  ;;  %v561_v26 = vand.u32 4294901760, %v5186_v0  ;;  %4021 = vmatprep.subr.bf16.mxu0 %v4020_v22  ;;  %v5198_v29 = vand.u32 4294901760, %v196_v35  ;;  %v117_v3 = vmul.f32 %v4595_v30, %v35_v18  ;;  %v159_v8 = vmul.f32 %v4624_v39, %v73_v40 }
  0x4c   :  { %6250 = vst [vmem:[#allocation27_spill] sm:$0xff] %v5195_v36  ;;  %v543_v45 = vand.u32 4294901760, %v542_v54  ;;  %v552_v2 = vsub.f32 %v5176_v57, %v551_v63  ;;  %3666 = vmatmul.mubr.f32.gmra.mrb[16].mxu0 %v551_v63  ;;  %v571_v9 = vand.u32 4294901760, %v5195_v36  ;;  %v3924_v28 = vpack.c.bf16 %v827_v58, %v820_v56  ;;  %v37_v63 = vld [vmem:[%s6091_s1 + $0xb8] sm:$0xff]  ;;  %v38_v57 = vld [vmem:[%s6091_s1 + $0xc0] sm:$0xff] }
  0x4d   :  { %6251 = vst [vmem:[#allocation28_spill] sm:$0xff] %v5198_v29  ;;  %v5210_v54 = vsub.f32 %v2927_v25, %v2927_v25  ;;  %v562_v18 = vsub.f32 %v5186_v0, %v561_v26  ;;  %3668 = vmatprep.mubr.f32.mxu0 %v561_v26  ;;  %v5214_v44 = vsub.f32 %v196_v35, %v5198_v29  ;;  %v75_v58 = vld [vmem:[%s6092_s2 + $0xb8] sm:$0xff] }
  0x4e   :  { %3398 = vmatprep.mubr.f32.mxu1 %v543_v45  ;;  %v553_v56 = vand.u32 4294901760, %v552_v2  ;;  %v572_v40 = vsub.f32 %v5195_v36, %v571_v9  ;;  %3925 = vmatprep.subr.bf16.mxu1 %v3924_v28  ;;  %v197_v45 = vsub.f32 %v117_v3, %v159_v8  ;;  %v118_v25 = vmul.f32 %v4595_v30, %v36_v49  ;;  %v76_v2 = vld [vmem:[%s6092_s2 + $0xc0] sm:$0xff] }
  0x4f   :  { %6252 = vst [vmem:[#allocation29_spill] sm:$0xff] %v5214_v44  ;;  %4023 = vmatpush3.bf16.msra.mxu0 %v4020_v22  ;;  %v563_v26 = vand.u32 4294901760, %v562_v18  ;;  %v581_v35 = vand.u32 4294901760, %v5214_v44  ;;  %3927 = vmatpush3.bf16.msra.mxu1 %v3924_v28  ;;  %v160_v0 = vmul.f32 %v4624_v39, %v74_v13  ;;  %v119_v3 = vmul.f32 %v4595_v30, %v37_v63  ;;  %v39_v28 = vld [vmem:[%s6091_s1 + $0xc8] sm:$0xff]  ;;  %v6283_v4 = vld [vmem:[#allocation22_spill] sm:$0xff] }
  0x50   :  { %3399 = vmatmul.mubr.f32.gmra.mrb[16].mxu1 %v553_v56  ;;  %v573_v36 = vand.u32 4294901760, %v572_v40  ;;  %3669 = vmatmul.mubr.f32.gmra.mrb[18].mxu0 %v571_v9  ;;  %v5232_v22 = vand.u32 4294901760, %v197_v45  ;;  %v161_v49 = vmul.f32 %v4624_v39, %v75_v58  ;;  %v77_v18 = vld [vmem:[%s6092_s2 + $0xc8] sm:$0xff]  ;;  %v832_v9 = vand.u32 4294901760, %v5191_v46 }
  0x51   :  { %3401 = vmatprep.mubr.f32.mxu1 %v563_v26  ;;  %v582_v8 = vsub.f32 %v5214_v44, %v581_v35  ;;  %3671 = vmatprep.mubr.f32.mxu0 %v581_v35  ;;  %v198_v13 = vsub.f32 %v118_v25, %v160_v0  ;;  %v839_v56 = vand.u32 4294901760, %v5210_v54  ;;  %v120_v40 = vmul.f32 %v4595_v30, %v38_v57  ;;  %v6284_v27 = vld [vmem:[#allocation23_spill] sm:$0xff] }
  0x52   :  { %6253 = vst [vmem:[#allocation30_spill] sm:$0xff] %v5232_v22  ;;  %v5246_v63 = vsub.f32 %v197_v45, %v5232_v22  ;;  %v199_v58 = vsub.f32 %v119_v3, %v161_v49  ;;  %v162_v26 = vmul.f32 %v4624_v39, %v76_v2  ;;  %v121_v0 = vmul.f32 %v4595_v30, %v39_v28 }
  0x53   :  { %v583_v29 = vand.u32 4294901760, %v582_v8  ;;  %v5250_v44 = vand.u32 4294901760, %v198_v13  ;;  %v163_v24 = vmul.f32 %v4624_v39, %v77_v18  ;;  %v5259_v45 = vsub.f32 %v4721_v7, %v4721_v7  ;;  %v40_v7 = vld [vmem:[%s6091_s1 + $0xd0] sm:$0xff] }
  0x54   :  { %6254 = vst [vmem:[#allocation31_spill] sm:$0xff] %v5246_v63  ;;  %3402 = vmatmul.mubr.f32.gmra.mrb[18].mxu1 %v573_v36  ;;  %v591_v25 = vand.u32 4294901760, %v5246_v63  ;;  %v5254_v35 = vand.u32 4294901760, %v199_v58  ;;  %v200_v33 = vsub.f32 %v120_v40, %v162_v26  ;;  %v833_v2 = vsub.f32 %v5191_v46, %v832_v9  ;;  %v78_v26 = vld [vmem:[%s6092_s2 + $0xd0] sm:$0xff] }
  0x55   :  { %6255 = vst [vmem:[#allocation32_spill] sm:$0xff] %v5250_v44  ;;  %3404 = vmatprep.mubr.f32.mxu1 %v583_v29  ;;  %v5262_v57 = vsub.f32 %v198_v13, %v5250_v44  ;;  %v840_v3 = vsub.f32 %v5210_v54, %v839_v56  ;;  %v201_v8 = vsub.f32 %v121_v0, %v163_v24  ;;  %v41_v0 = vld [vmem:[%s6091_s1 + $0xd8] sm:$0xff] }
  0x56   :  { %6256 = vst [vmem:[#allocation33_spill] sm:$0xff] %v5254_v35  ;;  %v592_v36 = vsub.f32 %v5246_v63, %v591_v25  ;;  %3672 = vmatmul.mubr.f32.gmra.mrb[20].mxu0 %v591_v25  ;;  %v5268_v49 = vsub.f32 %v199_v58, %v5254_v35  ;;  %v5270_v28 = vand.u32 4294901760, %v200_v33  ;;  %v834_v13 = vand.u32 4294901760, %v833_v2 }
  0x57   :  { %6257 = vst [vmem:[#allocation34_spill] sm:$0xff] %v5262_v57  ;;  %v601_v29 = vand.u32 4294901760, %v5262_v57  ;;  %v841_v18 = vand.u32 4294901760, %v840_v3  ;;  %v4024_v40 = vpack.c.bf16 %v839_v56, %v832_v9  ;;  %v5283_v24 = vand.u32 4294901760, %v201_v8  ;;  %v79_v9 = vld [vmem:[%s6092_s2 + $0xd8] sm:$0xff] }
  0x58   :  { %6258 = vst [vmem:[#allocation35_spill] sm:$0xff] %v5268_v49  ;;  %6259 = vst [vmem:[#allocation36_spill] sm:$0xff] %v5270_v28  ;;  %v593_v25 = vand.u32 4294901760, %v592_v36  ;;  %v611_v58 = vand.u32 4294901760, %v5268_v49  ;;  %v5281_v63 = vsub.f32 %v200_v33, %v5270_v28  ;;  %v122_v3 = vmul.f32 %v4595_v30, %v40_v7 }
  0x59   :  { %6261 = vst [vmem:[#allocation38_spill] sm:$0xff] %v5283_v24  ;;  %v602_v56 = vsub.f32 %v5262_v57, %v601_v29  ;;  %3674 = vmatprep.mubr.f32.mxu0 %v601_v29  ;;  %v3928_v2 = vpack.c.bf16 %v841_v18, %v834_v13  ;;  %4025 = vmatprep.subr.bf16.mxu0 %v4024_v40  ;;  %v42_v57 = vld [vmem:[%s6091_s1 + $0xe0] sm:$0xff] }
  0x5a   :  { %6260 = vst [vmem:[#allocation37_spill] sm:$0xff] %v5281_v63  ;;  %3405 = vmatmul.mubr.f32.gmra.mrb[20].mxu1 %v593_v25  ;;  %v612_v33 = vsub.f32 %v5268_v49, %v611_v58  ;;  %3675 = vmatmul.mubr.f32.gmra.mrb[22].mxu0 %v611_v58  ;;  %v621_v36 = vand.u32 4294901760, %v5281_v63  ;;  %v5296_v28 = vsub.f32 %v201_v8, %v5283_v24  ;;  %v80_v29 = vld [vmem:[%s6092_s2 + $0xe0] sm:$0xff]  ;;  %v846_v8 = vand.u32 4294901760, %v5259_v45 }
  0x5b   :  { %v164_v35 = vmul.f32 %v4624_v39, %v78_v26  ;;  %v603_v7 = vand.u32 4294901760, %v602_v56  ;;  %3929 = vmatprep.subr.bf16.mxu1 %v3928_v2  ;;  %4027 = vmatpush3.bf16.msra.mxu0 %v4024_v40  ;;  %v123_v13 = vmul.f32 %v4595_v30, %v41_v0  ;;  %v165_v18 = vmul.f32 %v4624_v39, %v79_v9  ;;  %v43_v56 = vld [vmem:[%s6091_s1 + $0xe8] sm:$0xff]  ;;  %v6287_v47 = vld [vmem:[#allocation30_spill] sm:$0xff] }
  0x5c   :  { %6262 = vst [vmem:[#allocation39_spill] sm:$0xff] %v5296_v28  ;;  %v613_v25 = vand.u32 4294901760, %v612_v33  ;;  %v622_v26 = vsub.f32 %v5281_v63, %v621_v36  ;;  %3677 = vmatprep.mubr.f32.mxu0 %v621_v36  ;;  %v631_v58 = vand.u32 4294901760, %v5296_v28  ;;  %3931 = vmatpush3.bf16.msra.mxu1 %v3928_v2  ;;  %v81_v40 = vld [vmem:[%s6092_s2 + $0xe8] sm:$0xff]  ;;  %v5318_v0 = vsub.f32 %v4731_v10, %v4731_v10  ;;  %v6288_v50 = vld [vmem:[#allocation32_spill] sm:$0xff] }
  0x5d   :  { %v202_v49 = vsub.f32 %v122_v3, %v164_v35  ;;  %3407 = vmatprep.mubr.f32.mxu1 %v603_v7  ;;  %v203_v9 = vsub.f32 %v123_v13, %v165_v18  ;;  %v124_v33 = vmul.f32 %v4595_v30, %v42_v57  ;;  %v166_v36 = vmul.f32 %v4624_v39, %v80_v29  ;;  %v44_v57 = vld [vmem:[%s6091_s1 + $0xf0] sm:$0xff]  ;;  %v6289_v52 = vld [vmem:[#allocation33_spill] sm:$0xff] }
  0x5e   :  { %3408 = vmatmul.mubr.f32.gmra.mrb[22].mxu1 %v613_v25  ;;  %v623_v35 = vand.u32 4294901760, %v622_v26  ;;  %v632_v2 = vsub.f32 %v5296_v28, %v631_v58  ;;  %3678 = vmatmul.mubr.f32.gmra.mrb[24].mxu0 %v631_v58  ;;  %v125_v44 = vmul.f32 %v4595_v30, %v43_v56  ;;  %v167_v10 = vmul.f32 %v4624_v39, %v81_v40  ;;  %v82_v29 = vld [vmem:[%s6092_s2 + $0xf0] sm:$0xff] }
  0x5f   :  { %v5323_v3 = vand.u32 4294901760, %v202_v49  ;;  %v5325_v63 = vand.u32 4294901760, %v203_v9  ;;  %v204_v24 = vsub.f32 %v124_v33, %v166_v36  ;;  %v847_v18 = vsub.f32 %v5259_v45, %v846_v8 }
  0x60   :  { %3410 = vmatprep.mubr.f32.mxu1 %v623_v35  ;;  %v633_v7 = vand.u32 4294901760, %v632_v2  ;;  %v205_v58 = vsub.f32 %v125_v44, %v167_v10  ;;  %v853_v56 = vand.u32 4294901760, %v5318_v0  ;;  %v126_v36 = vmul.f32 %v4595_v30, %v44_v57  ;;  %v45_v44 = vld [vmem:[%s6091_s1 + $0xf8] sm:$0xff] }
  0x61   :  { %6263 = vst [vmem:[#allocation40_spill] sm:$0xff] %v5323_v3  ;;  %6264 = vst [vmem:[#allocation41_spill] sm:$0xff] %v5325_v63  ;;  %v5336_v13 = vsub.f32 %v202_v49, %v5323_v3  ;;  %v5340_v25 = vsub.f32 %v203_v9, %v5325_v63  ;;  %v5342_v26 = vand.u32 4294901760, %v204_v24  ;;  %v848_v33 = vand.u32 4294901760, %v847_v18  ;;  %v83_v10 = vld [vmem:[%s6092_s2 + $0xf8] sm:$0xff] }
  0x62   :  { %3411 = vmatmul.mubr.f32.gmra.mrb[24].mxu1 %v633_v7  ;;  %v168_v35 = vmul.f32 %v4624_v39, %v82_v29  ;;  %v5352_v9 = vand.u32 4294901760, %v205_v58  ;;  %v854_v28 = vsub.f32 %v5318_v0, %v853_v56  ;;  %v4028_v39 = vpack.c.bf16 %v853_v56, %v846_v8  ;;  %v5375_v8 = vld [vmem:[%s6090_s0] ss:$0 sm:$0xff] }
  0x63   :  { %6265 = vst [vmem:[#allocation42_spill] sm:$0xff] %v5336_v13  ;;  %6266 = vst [vmem:[#allocation43_spill] sm:$0xff] %v5340_v25  ;;  %v641_v40 = vand.u32 4294901760, %v5336_v13  ;;  %v651_v49 = vand.u32 4294901760, %v5340_v25  ;;  %v5350_v2 = vsub.f32 %v204_v24, %v5342_v26  ;;  %v127_v56 = vmul.f32 %v5375_v8, %v45_v44  ;;  %v47_v44 = vld [vmem:[%s6091_s1 + $0x108] sm:$0xff] }
  0x64   :  { %6267 = vst [vmem:[#allocation44_spill] sm:$0xff] %v5342_v26  ;;  %6269 = vst [vmem:[#allocation46_spill] sm:$0xff] %v5352_v9  ;;  %v206_v57 = vsub.f32 %v126_v36, %v168_v35  ;;  %v5365_v7 = vsub.f32 %v205_v58, %v5352_v9  ;;  %v855_v18 = vand.u32 4294901760, %v854_v28  ;;  %v46_v26 = vld [vmem:[%s6091_s1 + $0x100] sm:$0xff]  ;;  %4029 = vmatprep.subr.bf16.mxu0 %v4028_v39 }
  0x65   :  { %6268 = vst [vmem:[#allocation45_spill] sm:$0xff] %v5350_v2  ;;  %v642_v30 = vsub.f32 %v5336_v13, %v641_v40  ;;  %3680 = vmatprep.mubr.f32.mxu0 %v641_v40  ;;  %v652_v24 = vsub.f32 %v5340_v25, %v651_v49  ;;  %v661_v29 = vand.u32 4294901760, %v5350_v2  ;;  %v5381_v58 = vld [vmem:[%s6090_s0 + $0x1] ss:$0 sm:$0xff]  ;;  %4031 = vmatpush3.bf16.msra.mxu0 %v4028_v39  ;;  %v48_v39 = vld [vmem:[%s6091_s1 + $0x110] sm:$0xff] }
  0x66   :  { %3681 = vmatmul.mubr.f32.gmra.mrb[26].mxu0 %v651_v49  ;;  %6270 = vst [vmem:[#allocation47_spill] sm:$0xff] %v5365_v7  ;;  %v5370_v3 = vand.u32 4294901760, %v206_v57  ;;  %v169_v28 = vmul.f32 %v5381_v58, %v83_v10  ;;  %v84_v40 = vld [vmem:[%s6092_s2 + $0x100] sm:$0xff]  ;;  %v671_v49 = vand.u32 4294901760, %v5365_v7  ;;  %v85_v10 = vld [vmem:[%s6092_s2 + $0x108] sm:$0xff]  ;;  %v5397_v25 = vsub.f32 %v4753_v15, %v4753_v15 }
  0x67   :  { %v643_v63 = vand.u32 4294901760, %v642_v30  ;;  %v653_v36 = vand.u32 4294901760, %v652_v24  ;;  %v662_v35 = vsub.f32 %v5350_v2, %v661_v29  ;;  %3683 = vmatprep.mubr.f32.mxu0 %v661_v29  ;;  %v3932_v30 = vpack.c.bf16 %v855_v18, %v848_v33 }
  0x68   :  { %6271 = vst [vmem:[#allocation48_spill] sm:$0xff] %v5370_v3  ;;  %v5400_v24 = vsub.f32 %v206_v57, %v5370_v3  ;;  %v207_v29 = vsub.f32 %v127_v56, %v169_v28  ;;  %v128_v33 = vmul.f32 %v5375_v8, %v46_v26  ;;  %v5408_v18 = vsub.f32 %v4789_v5, %v4789_v5  ;;  %v86_v57 = vld [vmem:[%s6092_s2 + $0x110] sm:$0xff] }
  0x69   :  { %3413 = vmatprep.mubr.f32.mxu1 %v643_v63  ;;  %v663_v2 = vand.u32 4294901760, %v662_v35  ;;  %v672_v15 = vsub.f32 %v5365_v7, %v671_v49  ;;  %v170_v63 = vmul.f32 %v5381_v58, %v84_v40  ;;  %3933 = vmatprep.subr.bf16.mxu1 %v3932_v30  ;;  %v129_v28 = vmul.f32 %v5375_v8, %v47_v44 }
  0x6a   :  { %6272 = vst [vmem:[#allocation49_spill] sm:$0xff] %v5400_v24  ;;  %3414 = vmatmul.mubr.f32.gmra.mrb[26].mxu1 %v653_v36  ;;  %3684 = vmatmul.mubr.f32.gmra.mrb[28].mxu0 %v671_v49  ;;  %v681_v26 = vand.u32 4294901760, %v5400_v24  ;;  %v5416_v56 = vand.u32 4294901760, %v207_v29  ;;  %v171_v5 = vmul.f32 %v5381_v58, %v85_v10  ;;  %v130_v49 = vmul.f32 %v5375_v8, %v48_v39 }
  0x6b   :  { %3416 = vmatprep.mubr.f32.mxu1 %v663_v2  ;;  %v673_v36 = vand.u32 4294901760, %v672_v15  ;;  %3935 = vmatpush3.bf16.msra.mxu1 %v3932_v30  ;;  %v208_v35 = vsub.f32 %v128_v33, %v170_v63  ;;  %v172_v3 = vmul.f32 %v5381_v58, %v86_v57  ;;  %v860_v44 = vand.u32 4294901760, %v5397_v25  ;;  %v49_v30 = vld [vmem:[%s6091_s1 + $0x118] sm:$0xff] }
  0x6c   :  { %6273 = vst [vmem:[#allocation50_spill] sm:$0xff] %v5416_v56  ;;  %v682_v40 = vsub.f32 %v5400_v24, %v681_v26  ;;  %3686 = vmatprep.mubr.f32.mxu0 %v681_v26  ;;  %v5423_v7 = vsub.f32 %v207_v29, %v5416_v56  ;;  %v209_v13 = vsub.f32 %v129_v28, %v171_v5  ;;  %v867_v2 = vand.u32 4294901760, %v5408_v18  ;;  %v87_v15 = vld [vmem:[%s6092_s2 + $0x118] sm:$0xff] }
  0x6d   :  { %v5426_v9 = vand.u32 4294901760, %v208_v35  ;;  %v210_v29 = vsub.f32 %v130_v49, %v172_v3  ;;  %v861_v57 = vsub.f32 %v5397_v25, %v860_v44  ;;  %v131_v49 = vmul.f32 %v5375_v8, %v49_v30 }
  0x6e   :  { %6274 = vst [vmem:[#allocation51_spill] sm:$0xff] %v5423_v7  ;;  %3417 = vmatmul.mubr.f32.gmra.mrb[28].mxu1 %v673_v36  ;;  %v683_v10 = vand.u32 4294901760, %v682_v40  ;;  %v691_v33 = vand.u32 4294901760, %v5423_v7  ;;  %v5434_v39 = vand.u32 4294901760, %v209_v13  ;;  %v868_v26 = vsub.f32 %v5408_v18, %v867_v2 }
  0x6f   :  { %6275 = vst [vmem:[#allocation52_spill] sm:$0xff] %v5426_v9  ;;  %v5440_v63 = vsub.f32 %v208_v35, %v5426_v9  ;;  %v4032_v28 = vpack.c.bf16 %v867_v2, %v860_v44  ;;  %v5448_v3 = vand.u32 4294901760, %v210_v29  ;;  %v50_v35 = vld [vmem:[%s6091_s1 + $0x120] sm:$0xff]  ;;  %v862_v24 = vand.u32 4294901760, %v861_v57  ;;  %v89_v57 = vld [vmem:[%s6092_s2 + $0x128] sm:$0x7f] }
  0x70   :  { %6276 = vst [vmem:[#allocation53_spill] sm:$0xff] %v5434_v39  ;;  %3419 = vmatprep.mubr.f32.mxu1 %v683_v10  ;;  %v692_v5 = vsub.f32 %v5423_v7, %v691_v33  ;;  %3687 = vmatmul.mubr.f32.gmra.mrb[30].mxu0 %v691_v33  ;;  %v5446_v36 = vsub.f32 %v209_v13, %v5434_v39  ;;  %v869_v9 = vand.u32 4294901760, %v868_v26  ;;  %v88_v13 = vld [vmem:[%s6092_s2 + $0x120] sm:$0xff]  ;;  %v51_v33 = vld [vmem:[%s6091_s1 + $0x128] sm:$0x7f] }
  0x71   :  { %6277 = vst [vmem:[#allocation54_spill] sm:$0xff] %v5448_v3  ;;  %v701_v40 = vand.u32 4294901760, %v5440_v63  ;;  %4033 = vmatprep.subr.bf16.mxu0 %v4032_v28  ;;  %v173_v44 = vmul.f32 %v5381_v58, %v87_v15  ;;  %v5461_v30 = vsub.f32 %v210_v29, %v5448_v3  ;;  %v174_v3 = vmul.f32 %v5381_v58, %v88_v13 }
  0x72   :  { %v693_v2 = vand.u32 4294901760, %v692_v5  ;;  %v711_v10 = vand.u32 4294901760, %v5446_v36  ;;  %4035 = vmatpush3.bf16.msra.mxu0 %v4032_v28  ;;  %v3936_v26 = vpack.c.bf16 %v869_v9, %v862_v24  ;;  %v132_v5 = vmul.f32 %v5375_v8, %v50_v35 }
  0x73   :  { %v702_v15 = vsub.f32 %v5440_v63, %v701_v40  ;;  %3689 = vmatprep.mubr.f32.mxu0 %v701_v40  ;;  %v211_v7 = vsub.f32 %v131_v49, %v173_v44  ;;  %v721_v28 = vand.u32 4294901760, %v5461_v30  ;;  %v133_v22 = vmul.f32 %v5375_v8, %v51_v33 }
  0x74   :  { %3420 = vmatmul.mubr.f32.gmra.mrb[30].mxu1 %v693_v2  ;;  %v712_v29 = vsub.f32 %v5446_v36, %v711_v10  ;;  %3690 = vmatmul.mubr.f32.gmra.mrb[32].mxu0 %v711_v10  ;;  %v175_v40 = vmul.f32 %v5381_v58, %v89_v57  ;;  %v6278_v9 = vmov 1.0|1.0   ;;  %v212_v35 = vsub.f32 %v132_v5, %v174_v3  ;;  %v6290_v3 = vld [vmem:[#allocation36_spill] sm:$0xff]  ;;  %v6293_v5 = vld [vmem:[#allocation41_spill] sm:$0xff] }
  0x75   :  { %v703_v39 = vand.u32 4294901760, %v702_v15  ;;  %3937 = vmatprep.subr.bf16.mxu1 %v3936_v26  ;;  %v5474_v56 = vand.u32 4294901760, %v211_v7  ;;  %4037 = vmatprep.subr.msk.bf16.mxu0 %vm4543_vm3, %v6278_v9  ;;  %v722_v49 = vsub.f32 %v5461_v30, %v721_v28  ;;  %v3940_v8 = vpack.c.bf16 %v4677_v60, %v4675_v59  ;;  %v6291_v15 = vld [vmem:[#allocation38_spill] sm:$0xff] }
  0x76   :  { %v713_v24 = vand.u32 4294901760, %v712_v29  ;;  %3692 = vmatprep.mubr.f32.mxu0 %v721_v28  ;;  %3939 = vmatpush3.bf16.msra.mxu1 %v3936_v26  ;;  %v213_v13 = vsub.f32 %v133_v22, %v175_v40  ;;  %v5487_v2 = vand.u32 4294901760, %v212_v35  ;;  %v3952_v10 = vpack.c.bf16 %v5052_v12, %v5040_v19  ;;  %v6292_v26 = vld [vmem:[#allocation40_spill] sm:$0xff]  ;;  %v6295_v28 = vld [vmem:[#allocation46_spill] sm:$0xff] }
  0x77   :  { %3422 = vmatprep.mubr.f32.mxu1 %v703_v39  ;;  %v5483_v44 = vsub.f32 %v211_v7, %v5474_v56  ;;  %v723_v58 = vand.u32 4294901760, %v722_v49  ;;  %3941 = vmatprep.subr.bf16.mxu1 %v3940_v8  ;;  %v3956_v7 = vpack.c.bf16 %v5140_v48, %v5083_v32  ;;  %v5498_v22 = vpack.c.bf16 %v5210_v54, %v5191_v46  ;;  %v6294_v29 = vld [vmem:[#allocation44_spill] sm:$0xff]  ;;  %v6299_v49 = vld [vmem:[#allocation53_spill] sm:$0xff] }
  0x78   :  { %3423 = vmatmul.mubr.f32.gmra.mrb[32].mxu1 %v713_v24  ;;  %v5492_v57 = vand.u32 4294901760, %v213_v13  ;;  %v5501_v59 = vsub.f32 %v212_v35, %v5487_v2  ;;  %v5505_v60 = vpack.c.bf16 %v5318_v0, %v5259_v45  ;;  %v5509_v19 = vpack.c.bf16 %v5408_v18, %v5397_v25  ;;  %v6296_v40 = vld [vmem:[#allocation48_spill] sm:$0xff]  ;;  %v6300_v35 = vld [vmem:[#allocation54_spill] sm:$0xff] }
  0x79   :  { %v731_v33 = vand.u32 4294901760, %v5483_v44  ;;  %3425 = vmatprep.mubr.f32.mxu1 %v723_v58  ;;  %v3944_v18 = vpack.c.bf16 %v4806_v38, %v4804_v37  ;;  %v6285_v37 = vld [vmem:[#allocation25_spill] sm:$0xff]  ;;  %v6286_v38 = vld [vmem:[#allocation28_spill] sm:$0xff] }
  0x7a   :  { %v5513_v32 = vsub.f32 %v213_v13, %v5492_v57  ;;  %v741_v48 = vand.u32 4294901760, %v5501_v59  ;;  %v6298_v24 = vld [vmem:[#allocation52_spill] sm:$0xff]  ;;  %v6301_v13 = vld [vmem:[#allocation2_spill] sm:$0xff]  ;;  %v6303_v58 = vld [vmem:[#allocation5_spill] sm:$0xff] }
  0x7b   :  { %v732_v12 = vsub.f32 %v5483_v44, %v731_v33  ;;  %3693 = vmatmul.mubr.f32.gmra.mrb[34].mxu0 %v731_v33  ;;  %v6320_v33 = vld [vmem:[#allocation27_spill] sm:$0xff] }
  0x7c   :  { %v751_v54 = vand.u32 4294901760, %v5513_v32  ;;  %v742_v39 = vsub.f32 %v5501_v59, %v741_v48  ;;  %3695 = vmatprep.mubr.f32.mxu0 %v741_v48  ;;  %v6326_v48 = vld [vmem:[#allocation39_spill] sm:$0xff] }
  0x7d   :  { %v733_v46 = vand.u32 4294901760, %v732_v12  ;;  %v6325_v12 = vld [vmem:[#allocation37_spill] sm:$0xff] }
  0x7e   :  { %v752_v45 = vsub.f32 %v5513_v32, %v751_v54  ;;  %v743_v0 = vand.u32 4294901760, %v742_v39  ;;  %v6329_v39 = vld [vmem:[#allocation45_spill] sm:$0xff] }
  0x7f   :  { %3426 = vmatmul.mubr.f32.gmra.mrb[34].mxu1 %v733_v46  ;;  %3696 = vmatmul.mubr.f32.gmra.mrb[36].mxu0 %v751_v54  ;;  %v6327_v46 = vld [vmem:[#allocation42_spill] sm:$0xff]  ;;  %v6328_v54 = vld [vmem:[#allocation43_spill] sm:$0xff] }
  0x80   :  { %3730 = vmatprep.mubr.f32.mxu0 %v4755_v16  ;;  %v753_v25 = vand.u32 4294901760, %v752_v45  ;;  %3428 = vmatprep.mubr.f32.mxu1 %v743_v0  ;;  %v6330_v45 = vld [vmem:[#allocation47_spill] sm:$0xff]  ;;  %v6331_v0 = vld [vmem:[#allocation49_spill] sm:$0xff] }
  0x83   :  { %3429 = vmatmul.mubr.f32.gmra.mrb[36].mxu1 %v753_v25  ;;  %3731 = vmatmul.mubr.f32.vlgmr.msra.gmra.mrb[0].mxu0 %v4757_v17  ;;  %v6332_v25 = vld [vmem:[#allocation51_spill] sm:$0xff] }
  0x84   :  { %3463 = vmatprep.mubr.f32.mxu1 %v4755_v16  ;;  %4039 = vmatpush3.bf16.msk.msra.mxu0 %vm4543_vm3, %v6278_v9  ;;  %vm6279_vm3 = vnez %v6192_v31  ;;  %v6281_v31 = vld [vmem:[#allocation20_spill] sm:$0xff] }
  0x85   :  { %3733 = vmatprep.mubr.f32.mxu0 %v4865_v11  ;;  %4041 = vmatprep.subr.msk.bf16.mxu0 %vm4562_vm5, %v6278_v9 }
  0x87   :  { %3464 = vmatmul.mubr.f32.vlgmr.msra.gmra.mrb[0].mxu1 %v4757_v17  ;;  %3734 = vmatmul.mubr.f32.gmra.mrb[2].mxu0 %v4876_v14 }
  0x88   :  { %3943 = vmatpush3.bf16.msra.mxu1 %v3940_v8  ;;  %3466 = vmatprep.mubr.f32.mxu1 %v4865_v11  ;;  %v6302_v8 = vld [vmem:[#allocation3_spill] sm:$0xff] }
  0x89   :  { %3736 = vmatprep.mubr.f32.mxu0 %v4902_v41  ;;  %3945 = vmatprep.subr.bf16.mxu1 %v3944_v18 }
  0x8a   :  { %4043 = vmatpush3.bf16.msk.msra.mxu0 %vm4562_vm5, %v6278_v9 }
  0x8b   :  { %3467 = vmatmul.mubr.f32.gmra.mrb[2].mxu1 %v4876_v14  ;;  %3737 = vmatmul.mubr.f32.gmra.mrb[4].mxu0 %v4924_v55 }
  0x8c   :  { %3469 = vmatprep.mubr.f32.mxu1 %v4902_v41  ;;  %3947 = vmatpush3.bf16.msra.mxu1 %v3944_v18 }
  0x8d   :  { %3739 = vmatprep.mubr.f32.mxu0 %v4956_v42  ;;  %3949 = vmatprep.subr.bf16.mxu1 %v3948_v20 }
  0x8e   :  { %4045 = vmatprep.subr.msk.bf16.mxu0 %vm6279_vm3, %v6278_v9 }
  0x8f   :  { %3470 = vmatmul.mubr.f32.gmra.mrb[4].mxu1 %v4924_v55  ;;  %3740 = vmatmul.mubr.f32.gmra.mrb[6].mxu0 %v4979_v1 }
  0x90   :  { %3472 = vmatprep.mubr.f32.mxu1 %v4956_v42  ;;  %3742 = vmatprep.mubr.f32.mxu0 %v4994_v43 }
  0x91   :  { %3951 = vmatpush3.bf16.msra.mxu1 %v3948_v20  ;;  %4047 = vmatpush3.bf16.msk.msra.mxu0 %vm6279_vm3, %v6278_v9 }
  0x92   :  { %3953 = vmatprep.subr.bf16.mxu1 %v3952_v10  ;;  %4049 = vmatprep.subr.msk.bf16.mxu0 %vm4658_vm11, %v6278_v9 }
  0x93   :  { %3473 = vmatmul.mubr.f32.gmra.mrb[6].mxu1 %v4979_v1  ;;  %3743 = vmatmul.mubr.f32.gmra.mrb[8].mxu0 %v5004_v61 }
  0x94   :  { %3475 = vmatprep.mubr.f32.mxu1 %v4994_v43  ;;  %3745 = vmatprep.mubr.f32.mxu0 %v5019_v53 }
  0x95   :  { %3955 = vmatpush3.bf16.msra.mxu1 %v3952_v10  ;;  %4051 = vmatpush3.bf16.msk.msra.mxu0 %vm4658_vm11, %v6278_v9  ;;  %v6304_v10 = vld [vmem:[#allocation6_spill] sm:$0xff] }
  0x96   :  { %3957 = vmatprep.subr.bf16.mxu1 %v3956_v7  ;;  %4053 = vmatprep.subr.msk.bf16.mxu0 %vm4709_vm0, %v6278_v9 }
  0x97   :  { %3476 = vmatmul.mubr.f32.gmra.mrb[8].mxu1 %v5004_v61  ;;  %3746 = vmatmul.mubr.f32.gmra.mrb[10].mxu0 %v5054_v62 }
  0x98   :  { %3478 = vmatprep.mubr.f32.mxu1 %v5019_v53  ;;  %3748 = vmatprep.mubr.f32.mxu0 %v5076_v34 }
  0x99   :  { %3959 = vmatpush3.bf16.msra.mxu1 %v3956_v7  ;;  %4055 = vmatpush3.bf16.msk.msra.mxu0 %vm4709_vm0, %v6278_v9  ;;  %v6321_v7 = vld [vmem:[#allocation29_spill] sm:$0xff] }
  0x9a   :  { %3961 = vmatprep.subr.bf16.mxu1 %v5498_v22  ;;  %4057 = vmatprep.subr.msk.bf16.mxu0 %vm4782_vm6, %v6278_v9 }
  0x9b   :  { %3479 = vmatmul.mubr.f32.gmra.mrb[10].mxu1 %v5054_v62  ;;  %3749 = vmatmul.mubr.f32.gmra.mrb[12].mxu0 %v5080_v6 }
  0x9c   :  { %3481 = vmatprep.mubr.f32.mxu1 %v5076_v34  ;;  %3751 = vmatprep.mubr.f32.mxu0 %v5094_v21 }
  0x9d   :  { %3963 = vmatpush3.bf16.msra.mxu1 %v5498_v22  ;;  %4059 = vmatpush3.bf16.msk.msra.mxu0 %vm4782_vm6, %v6278_v9  ;;  %v6322_v22 = vld [vmem:[#allocation31_spill] sm:$0xff] }
  0x9e   :  { %3965 = vmatprep.subr.bf16.mxu1 %v5505_v60  ;;  %4061 = vmatprep.subr.msk.bf16.mxu0 %vm4843_vm7, %v6278_v9 }
  0x9f   :  { %3482 = vmatmul.mubr.f32.gmra.mrb[12].mxu1 %v5080_v6  ;;  %3752 = vmatmul.mubr.f32.gmra.mrb[14].mxu0 %v6280_v23 }
  0xa0   :  { %3484 = vmatprep.mubr.f32.mxu1 %v5094_v21  ;;  %3754 = vmatprep.mubr.f32.mxu0 %v6281_v31 }
  0xa1   :  { %3967 = vmatpush3.bf16.msra.mxu1 %v5505_v60  ;;  %4063 = vmatpush3.bf16.msk.msra.mxu0 %vm4843_vm7, %v6278_v9  ;;  %v6323_v60 = vld [vmem:[#allocation34_spill] sm:$0xff] }
  0xa2   :  { %3969 = vmatprep.subr.bf16.mxu1 %v5509_v19  ;;  %4065 = vmatprep.subr.msk.bf16.mxu0 %vm4884_vm15, %v6278_v9 }
  0xa3   :  { %3485 = vmatmul.mubr.f32.gmra.mrb[14].mxu1 %v6280_v23  ;;  %3755 = vmatmul.mubr.f32.gmra.mrb[16].mxu0 %v6283_v4 }
  0xa4   :  { %3487 = vmatprep.mubr.f32.mxu1 %v6281_v31  ;;  %3757 = vmatprep.mubr.f32.mxu0 %v6284_v27 }
  0xa5   :  { %3971 = vmatpush3.bf16.msra.mxu1 %v5509_v19  ;;  %4067 = vmatpush3.bf16.msk.msra.mxu0 %vm4884_vm15, %v6278_v9  ;;  %v6297_v9 = vld [vmem:[#allocation50_spill] sm:$0xff]  ;;  %v6324_v19 = vld [vmem:[#allocation35_spill] sm:$0xff] }
  0xa7   :  { %3488 = vmatmul.mubr.f32.gmra.mrb[16].mxu1 %v6283_v4  ;;  %3758 = vmatmul.mubr.f32.gmra.mrb[18].mxu0 %v6285_v37 }
  0xa8   :  { %3490 = vmatprep.mubr.f32.mxu1 %v6284_v27  ;;  %3760 = vmatprep.mubr.f32.mxu0 %v6286_v38 }
  0xab   :  { %3491 = vmatmul.mubr.f32.gmra.mrb[18].mxu1 %v6285_v37  ;;  %3761 = vmatmul.mubr.f32.gmra.mrb[20].mxu0 %v6287_v47 }
  0xac   :  { %3493 = vmatprep.mubr.f32.mxu1 %v6286_v38  ;;  %3763 = vmatprep.mubr.f32.mxu0 %v6288_v50 }
  0xaf   :  { %3494 = vmatmul.mubr.f32.gmra.mrb[20].mxu1 %v6287_v47  ;;  %3764 = vmatmul.mubr.f32.gmra.mrb[22].mxu0 %v6289_v52 }
  0xb0   :  { %3496 = vmatprep.mubr.f32.mxu1 %v6288_v50  ;;  %3766 = vmatprep.mubr.f32.mxu0 %v6290_v3 }
  0xb3   :  { %3497 = vmatmul.mubr.f32.gmra.mrb[22].mxu1 %v6289_v52  ;;  %3767 = vmatmul.mubr.f32.gmra.mrb[24].mxu0 %v6291_v15 }
  0xb4   :  { %3499 = vmatprep.mubr.f32.mxu1 %v6290_v3  ;;  %3769 = vmatprep.mubr.f32.mxu0 %v6292_v26 }
  0xb7   :  { %3500 = vmatmul.mubr.f32.gmra.mrb[24].mxu1 %v6291_v15  ;;  %3770 = vmatmul.mubr.f32.gmra.mrb[26].mxu0 %v6293_v5 }
  0xb8   :  { %3502 = vmatprep.mubr.f32.mxu1 %v6292_v26  ;;  %3772 = vmatprep.mubr.f32.mxu0 %v6294_v29 }
  0xbb   :  { %3503 = vmatmul.mubr.f32.gmra.mrb[26].mxu1 %v6293_v5  ;;  %3773 = vmatmul.mubr.f32.gmra.mrb[28].mxu0 %v6295_v28 }
  0xbc   :  { %3505 = vmatprep.mubr.f32.mxu1 %v6294_v29  ;;  %3775 = vmatprep.mubr.f32.mxu0 %v6296_v40 }
  0xbf   :  { %3506 = vmatmul.mubr.f32.gmra.mrb[28].mxu1 %v6295_v28  ;;  %3776 = vmatmul.mubr.f32.gmra.mrb[30].mxu0 %v6297_v9 }
  0xc0   :  { %3508 = vmatprep.mubr.f32.mxu1 %v6296_v40  ;;  %3778 = vmatprep.mubr.f32.mxu0 %v6298_v24 }
  0xc3   :  { %3509 = vmatmul.mubr.f32.gmra.mrb[30].mxu1 %v6297_v9  ;;  %3779 = vmatmul.mubr.f32.gmra.mrb[32].mxu0 %v6299_v49 }
  0xc4   :  { %3511 = vmatprep.mubr.f32.mxu1 %v6298_v24  ;;  %3781 = vmatprep.mubr.f32.mxu0 %v6300_v35 }
  0xc7   :  { %3512 = vmatmul.mubr.f32.gmra.mrb[32].mxu1 %v6299_v49  ;;  %3782 = vmatmul.mubr.f32.gmra.mrb[34].mxu0 %v5474_v56 }
  0xc8   :  { %3514 = vmatprep.mubr.f32.mxu1 %v6300_v35  ;;  %3784 = vmatprep.mubr.f32.mxu0 %v5487_v2 }
  0xcb   :  { %3515 = vmatmul.mubr.f32.gmra.mrb[34].mxu1 %v5474_v56  ;;  %3785 = vmatmul.mubr.f32.gmra.mrb[36].mxu0 %v5492_v57 }
  0xcc   :  { %3517 = vmatprep.mubr.f32.mxu1 %v5487_v2  ;;  %3819 = vmatprep.mubr.f32.mxu0 %v4755_v16  ;;  %v6305_v16 = vld [vmem:[#allocation7_spill] sm:$0xff] }
  0xcf   :  { %3518 = vmatmul.mubr.f32.gmra.mrb[36].mxu1 %v5492_v57  ;;  %3820 = vmatmul.mubr.f32.vlgmr.msra.gmra.mrb[0].mxu0 %v4757_v17  ;;  %v6306_v17 = vld [vmem:[#allocation8_spill] sm:$0xff] }
  0xd0   :  { %3552 = vmatprep.mubr.f32.mxu1 %v6301_v13  ;;  %3822 = vmatprep.mubr.f32.mxu0 %v4865_v11  ;;  %v6307_v11 = vld [vmem:[#allocation9_spill] sm:$0xff] }
  0xd3   :  { %3553 = vmatmul.mubr.f32.vlgmr.msra.gmra.mrb[0].mxu1 %v6302_v8  ;;  %3823 = vmatmul.mubr.f32.gmra.mrb[2].mxu0 %v4876_v14  ;;  %v6308_v14 = vld [vmem:[#allocation10_spill] sm:$0xff] }
  0xd4   :  { %3555 = vmatprep.mubr.f32.mxu1 %v6303_v58  ;;  %3825 = vmatprep.mubr.f32.mxu0 %v4902_v41  ;;  %v6309_v41 = vld [vmem:[#allocation11_spill] sm:$0xff] }
  0xd7   :  { %3556 = vmatmul.mubr.f32.gmra.mrb[2].mxu1 %v6304_v10  ;;  %3826 = vmatmul.mubr.f32.gmra.mrb[4].mxu0 %v4924_v55  ;;  %v6310_v55 = vld [vmem:[#allocation12_spill] sm:$0xff] }
  0xd8   :  { %3558 = vmatprep.mubr.f32.mxu1 %v6305_v16  ;;  %3828 = vmatprep.mubr.f32.mxu0 %v4956_v42  ;;  %v6311_v42 = vld [vmem:[#allocation13_spill] sm:$0xff] }
  0xdb   :  { %3559 = vmatmul.mubr.f32.gmra.mrb[4].mxu1 %v6306_v17  ;;  %3829 = vmatmul.mubr.f32.gmra.mrb[6].mxu0 %v4979_v1  ;;  %v6312_v1 = vld [vmem:[#allocation14_spill] sm:$0xff] }
  0xdc   :  { %3561 = vmatprep.mubr.f32.mxu1 %v6307_v11  ;;  %3831 = vmatprep.mubr.f32.mxu0 %v4994_v43  ;;  %v6313_v43 = vld [vmem:[#allocation15_spill] sm:$0xff] }
  0xdf   :  { %3562 = vmatmul.mubr.f32.gmra.mrb[6].mxu1 %v6308_v14  ;;  %3832 = vmatmul.mubr.f32.gmra.mrb[8].mxu0 %v5004_v61  ;;  %v6314_v61 = vld [vmem:[#allocation16_spill] sm:$0xff] }
  0xe0   :  { %3564 = vmatprep.mubr.f32.mxu1 %v6309_v41  ;;  %3834 = vmatprep.mubr.f32.mxu0 %v5019_v53  ;;  %v6315_v53 = vld [vmem:[#allocation17_spill] sm:$0xff] }
  0xe3   :  { %3565 = vmatmul.mubr.f32.gmra.mrb[8].mxu1 %v6310_v55  ;;  %3835 = vmatmul.mubr.f32.gmra.mrb[10].mxu0 %v5054_v62  ;;  %v6316_v62 = vld [vmem:[#allocation19_spill] sm:$0xff] }
  0xe4   :  { %3567 = vmatprep.mubr.f32.mxu1 %v6311_v42  ;;  %3837 = vmatprep.mubr.f32.mxu0 %v5076_v34  ;;  %v6317_v34 = vld [vmem:[#allocation21_spill] sm:$0xff] }
  0xe7   :  { %3568 = vmatmul.mubr.f32.gmra.mrb[10].mxu1 %v6312_v1  ;;  %3838 = vmatmul.mubr.f32.gmra.mrb[12].mxu0 %v5080_v6  ;;  %v6318_v6 = vld [vmem:[#allocation24_spill] sm:$0xff] }
  0xe8   :  { %3570 = vmatprep.mubr.f32.mxu1 %v6313_v43  ;;  %3840 = vmatprep.mubr.f32.mxu0 %v5094_v21  ;;  %v6319_v21 = vld [vmem:[#allocation26_spill] sm:$0xff] }
  0xeb   :  { %3571 = vmatmul.mubr.f32.gmra.mrb[12].mxu1 %v6314_v61  ;;  %3841 = vmatmul.mubr.f32.gmra.mrb[14].mxu0 %v6280_v23 }
  0xec   :  { %3573 = vmatprep.mubr.f32.mxu1 %v6315_v53  ;;  %3843 = vmatprep.mubr.f32.mxu0 %v6281_v31 }
  0xef   :  { %3574 = vmatmul.mubr.f32.gmra.mrb[14].mxu1 %v6316_v62  ;;  %3844 = vmatmul.mubr.f32.gmra.mrb[16].mxu0 %v6283_v4 }
  0xf0   :  { %3576 = vmatprep.mubr.f32.mxu1 %v6317_v34  ;;  %3846 = vmatprep.mubr.f32.mxu0 %v6284_v27 }
  0xf3   :  { %3577 = vmatmul.mubr.f32.gmra.mrb[16].mxu1 %v6318_v6  ;;  %3847 = vmatmul.mubr.f32.gmra.mrb[18].mxu0 %v6285_v37 }
  0xf4   :  { %3579 = vmatprep.mubr.f32.mxu1 %v6319_v21  ;;  %3849 = vmatprep.mubr.f32.mxu0 %v6286_v38 }
  0xf7   :  { %3580 = vmatmul.mubr.f32.gmra.mrb[18].mxu1 %v6320_v33  ;;  %3850 = vmatmul.mubr.f32.gmra.mrb[20].mxu0 %v6287_v47 }
  0xf8   :  { %3582 = vmatprep.mubr.f32.mxu1 %v6321_v7  ;;  %3852 = vmatprep.mubr.f32.mxu0 %v6288_v50 }
  0xfb   :  { %3583 = vmatmul.mubr.f32.gmra.mrb[20].mxu1 %v6322_v22  ;;  %3853 = vmatmul.mubr.f32.gmra.mrb[22].mxu0 %v6289_v52 }
  0xfc   :  { %3585 = vmatprep.mubr.f32.mxu1 %v6323_v60  ;;  %3855 = vmatprep.mubr.f32.mxu0 %v6290_v3 }
  0xff   :  { %3586 = vmatmul.mubr.f32.gmra.mrb[22].mxu1 %v6324_v19  ;;  %3856 = vmatmul.mubr.f32.gmra.mrb[24].mxu0 %v6291_v15 }
 0x100   :  { %3588 = vmatprep.mubr.f32.mxu1 %v6325_v12  ;;  %3858 = vmatprep.mubr.f32.mxu0 %v6292_v26 }
 0x103   :  { %3589 = vmatmul.mubr.f32.gmra.mrb[24].mxu1 %v6326_v48  ;;  %3859 = vmatmul.mubr.f32.gmra.mrb[26].mxu0 %v6293_v5 }
 0x104   :  { %3591 = vmatprep.mubr.f32.mxu1 %v6327_v46  ;;  %3861 = vmatprep.mubr.f32.mxu0 %v6294_v29 }
 0x107   :  { %3592 = vmatmul.mubr.f32.gmra.mrb[26].mxu1 %v6328_v54  ;;  %3862 = vmatmul.mubr.f32.gmra.mrb[28].mxu0 %v6295_v28 }
 0x108   :  { %3594 = vmatprep.mubr.f32.mxu1 %v6329_v39  ;;  %3864 = vmatprep.mubr.f32.mxu0 %v6296_v40 }
 0x10b   :  { %3595 = vmatmul.mubr.f32.gmra.mrb[28].mxu1 %v6330_v45  ;;  %3865 = vmatmul.mubr.f32.gmra.mrb[30].mxu0 %v6297_v9 }
 0x10c   :  { %3597 = vmatprep.mubr.f32.mxu1 %v6331_v0  ;;  %3867 = vmatprep.mubr.f32.mxu0 %v6298_v24 }
 0x10f   :  { %3598 = vmatmul.mubr.f32.gmra.mrb[30].mxu1 %v6332_v25  ;;  %3868 = vmatmul.mubr.f32.gmra.mrb[32].mxu0 %v6299_v49  ;;  %v4414_v25 = vld [vmem:[%s6091_s1 + $0x8] sm:$0xff] }
 0x110   :  { %3600 = vmatprep.mubr.f32.mxu1 %v5440_v63  ;;  %3870 = vmatprep.mubr.f32.mxu0 %v6300_v35 }
 0x113   :  { %3601 = vmatmul.mubr.f32.gmra.mrb[32].mxu1 %v5446_v36  ;;  %3871 = vmatmul.mubr.f32.gmra.mrb[34].mxu0 %v5474_v56 }
 0x114   :  { %3603 = vmatprep.mubr.f32.mxu1 %v5461_v30  ;;  %3873 = vmatprep.mubr.f32.mxu0 %v5487_v2 }
 0x117   :  { %3604 = vmatmul.mubr.f32.gmra.mrb[34].mxu1 %v5483_v44  ;;  %3874 = vmatmul.mubr.f32.gmra.mrb[36].mxu0 %v5492_v57 }
 0x118   :  { %3606 = vmatprep.mubr.f32.mxu1 %v5501_v59 }
 0x11b   :  { %3607 = vmatmul.mubr.f32.gmra.mrb[36].mxu1 %v5513_v32 }
 0x1a2   :  { %v3821_v18 = vpop.f32.mrb[0].mxu0 }
 0x1a3   :  { %v2304_v63 = vpop.f32.mrb[1].mxu0 }
 0x1a6   :  { %v3554_v20 = vpop.f32.mrb[0].mxu1  ;;  %v3824_v23 = vpop.f32.mrb[2].mxu0 }
 0x1a7   :  { %v4068_v31 = vadd.f32 %v3821_v18, %v3554_v20  ;;  %v1232_v36 = vpop.f32.mrb[1].mxu1  ;;  %v2316_v51 = vpop.f32.mrb[3].mxu0  ;;  %v4415_v18 = vld [vmem:[%s6092_s2 + $0x8] sm:$0xff] }
 0x1a8   :  { %v4069_v56 = vadd.f32 %v2304_v63, %v1232_v36  ;;  %v2759_v63 = vsub.f32 %v4414_v25, %v4415_v18 }
 0x1a9   :  { %v2981_v4 = vmul.f32 -1.442695, %v4068_v31 }
 0x1aa   :  { %v2980_v30 = vmul.f32 -1.442695, %v4069_v56  ;;  %v3557_v27 = vpop.f32.mrb[2].mxu1  ;;  %v3827_v2 = vpop.f32.mrb[4].mxu0  ;;  %v4417_v56 = vld [vmem:[%s6092_s2] sm:$0xff] }
 0x1ab   :  { %4260 = vpow2.f32 %v2981_v4  ;;  %v4070_v44 = vadd.f32 %v3824_v23, %v3557_v27  ;;  %v1246_v37 = vpop.f32.mrb[3].mxu1  ;;  %v2328_v57 = vpop.f32.mrb[5].mxu0 }
 0x1ac   :  { %4262 = vpow2.f32 %v2980_v30  ;;  %v4071_v59 = vadd.f32 %v2316_v51, %v1246_v37  ;;  %v4416_v51 = vld [vmem:[%s6091_s1] sm:$0xff] }
 0x1ad   :  { %v2983_v38 = vmul.f32 -1.442695, %v4070_v44  ;;  %v2758_v4 = vsub.f32 %v4416_v51, %v4417_v56 }
 0x1ae   :  { %v2982_v32 = vmul.f32 -1.442695, %v4071_v59  ;;  %v3560_v47 = vpop.f32.mrb[4].mxu1  ;;  %v3830_v50 = vpop.f32.mrb[6].mxu0 }
 0x1af   :  { %4264 = vpow2.f32 %v2983_v38  ;;  %v4072_v52 = vadd.f32 %v3827_v2, %v3560_v47  ;;  %v1260_v3 = vpop.f32.mrb[5].mxu1  ;;  %v2340_v15 = vpop.f32.mrb[7].mxu0  ;;  %v4418_v47 = vld [vmem:[%s6091_s1 + $0x18] sm:$0xff] }
 0x1b0   :  { %4266 = vpow2.f32 %v2982_v32  ;;  %v4073_v26 = vadd.f32 %v2328_v57, %v1260_v3 }
 0x1b1   :  { %v2985_v5 = vmul.f32 -1.442695, %v4072_v52 }
 0x1b2   :  { %v2984_v29 = vmul.f32 -1.442695, %v4073_v26  ;;  %v3563_v28 = vpop.f32.mrb[6].mxu1  ;;  %v3833_v40 = vpop.f32.mrb[8].mxu0 }
 0x1b3   :  { %4268 = vpow2.f32 %v2985_v5  ;;  %v4074_v9 = vadd.f32 %v3830_v50, %v3563_v28  ;;  %v1274_v24 = vpop.f32.mrb[7].mxu1  ;;  %v2352_v49 = vpop.f32.mrb[9].mxu0  ;;  %v4419_v50 = vld [vmem:[%s6092_s2 + $0x18] sm:$0xff]  ;;  %v4420_v28 = vld [vmem:[%s6091_s1 + $0x10] sm:$0xff] }
 0x1b4   :  { %4270 = vpow2.f32 %v2984_v29  ;;  %v4075_v35 = vadd.f32 %v2340_v15, %v1274_v24  ;;  %v2761_v52 = vsub.f32 %v4418_v47, %v4419_v50 }
 0x1b5   :  { %v4261_v13 = vpop.eup %4260  ;;  %v2987_v8 = vmul.f32 -1.442695, %v4074_v9 }
 0x1b6   :  { %v4263_v58 = vpop.eup %4262  ;;  %v2645_v10 = vadd.f32 1.0, %v4261_v13  ;;  %v2986_v16 = vmul.f32 -1.442695, %v4075_v35  ;;  %v3566_v17 = vpop.f32.mrb[8].mxu1 }
 0x1b7   :  { %v3836_v11 = vpop.f32.mrb[10].mxu0  ;;  %v2644_v14 = vadd.f32 1.0, %v4263_v58  ;;  %4272 = vpow2.f32 %v2987_v8  ;;  %v4076_v41 = vadd.f32 %v3833_v40, %v3566_v17  ;;  %v1288_v55 = vpop.f32.mrb[9].mxu1  ;;  %v4421_v40 = vld [vmem:[%s6092_s2 + $0x10] sm:$0xff] }
 0x1b8   :  { %v2364_v42 = vpop.f32.mrb[11].mxu0  ;;  %4274 = vrcp.f32 %v2645_v10  ;;  %v4077_v1 = vadd.f32 %v2352_v49, %v1288_v55  ;;  %v2760_v9 = vsub.f32 %v4420_v28, %v4421_v40 }
 0x1b9   :  { %v4265_v43 = vpop.eup %4264  ;;  %4276 = vrcp.f32 %v2644_v14  ;;  %v2989_v61 = vmul.f32 -1.442695, %v4076_v41 }
 0x1ba   :  { %v4267_v53 = vpop.eup %4266  ;;  %v2647_v62 = vadd.f32 1.0, %v4265_v43  ;;  %4278 = vpow2.f32 %v2986_v16  ;;  %v2988_v34 = vmul.f32 -1.442695, %v4077_v1  ;;  %v3569_v6 = vpop.f32.mrb[10].mxu1  ;;  %v4423_v1 = vld [vmem:[%s6092_s2 + $0x28] sm:$0xff] }
 0x1bb   :  { %v3839_v21 = vpop.f32.mrb[12].mxu0  ;;  %v2646_v33 = vadd.f32 1.0, %v4267_v53  ;;  %4280 = vpow2.f32 %v2989_v61  ;;  %v4078_v7 = vadd.f32 %v3836_v11, %v3569_v6  ;;  %v1302_v22 = vpop.f32.mrb[11].mxu1 }
 0x1bc   :  { %v2376_v60 = vpop.f32.mrb[13].mxu0  ;;  %4282 = vrcp.f32 %v2647_v62  ;;  %v4079_v19 = vadd.f32 %v2364_v42, %v1302_v22  ;;  %v4422_v42 = vld [vmem:[%s6091_s1 + $0x28] sm:$0xff] }
 0x1bd   :  { %v4269_v12 = vpop.eup %4268  ;;  %4284 = vrcp.f32 %v2646_v33  ;;  %v2991_v48 = vmul.f32 -1.442695, %v4078_v7  ;;  %v2763_v43 = vsub.f32 %v4422_v42, %v4423_v1  ;;  %v4425_v33 = vld [vmem:[%s6092_s2 + $0x20] sm:$0xff]  ;;  %v4434_v42 = vld [vmem:[%s6091_s1 + $0x50] sm:$0xff] }
 0x1be   :  { %v4271_v46 = vpop.eup %4270  ;;  %v2649_v54 = vadd.f32 1.0, %v4269_v12  ;;  %4286 = vpow2.f32 %v2988_v34  ;;  %v2990_v39 = vmul.f32 -1.442695, %v4079_v19  ;;  %v3572_v45 = vpop.f32.mrb[12].mxu1 }
 0x1bf   :  { %v3842_v0 = vpop.f32.mrb[14].mxu0  ;;  %v2648_v20 = vadd.f32 1.0, %v4271_v46  ;;  %4288 = vpow2.f32 %v2991_v48  ;;  %v4080_v23 = vadd.f32 %v3839_v21, %v3572_v45  ;;  %v1316_v31 = vpop.f32.mrb[13].mxu1  ;;  %v4424_v21 = vld [vmem:[%s6091_s1 + $0x20] sm:$0xff] }
 0x1c0   :  { %v2388_v36 = vpop.f32.mrb[15].mxu0  ;;  %4290 = vrcp.f32 %v2649_v54  ;;  %v4081_v30 = vadd.f32 %v2376_v60, %v1316_v31  ;;  %v2762_v7 = vsub.f32 %v4424_v21, %v4425_v33  ;;  %v4436_v21 = vld [vmem:[%s6091_s1 + $0x58] sm:$0xff] }
 0x1c1   :  { %v4273_v27 = vpop.eup %4272  ;;  %4292 = vrcp.f32 %v2648_v20  ;;  %v2993_v2 = vmul.f32 -1.442695, %v4080_v23  ;;  %v4426_v20 = vld [vmem:[%s6091_s1 + $0x38] sm:$0xff] }
 0x1c2   :  { %v4275_v44 = vpop.eup %4274  ;;  %v2651_v37 = vadd.f32 1.0, %v4273_v27  ;;  %4294 = vpow2.f32 %v2990_v39  ;;  %v2992_v57 = vmul.f32 -1.442695, %v4081_v30  ;;  %v3575_v59 = vpop.f32.mrb[14].mxu1  ;;  %v4427_v23 = vld [vmem:[%s6092_s2 + $0x38] sm:$0xff]  ;;  %v4428_v27 = vld [vmem:[%s6091_s1 + $0x30] sm:$0xff] }
 0x1c3   :  { %v3845_v38 = vpop.f32.mrb[16].mxu0  ;;  %v4277_v32 = vpop.eup %4276  ;;  %v2797_v3 = vmul.f32 %v4275_v44, %v2759_v63  ;;  %4296 = vpow2.f32 %v2993_v2  ;;  %v4082_v15 = vadd.f32 %v3842_v0, %v3575_v59  ;;  %v2765_v31 = vsub.f32 %v4426_v20, %v4427_v23  ;;  %v4429_v2 = vld [vmem:[%s6092_s2 + $0x30] sm:$0xff]  ;;  %v4438_v20 = vld [vmem:[%s6091_s1 + $0x60] sm:$0xff] }
 0x1c4   :  { %v1330_v26 = vpop.f32.mrb[15].mxu1  ;;  %v2400_v5 = vpop.f32.mrb[17].mxu0  ;;  %v2796_v24 = vmul.f32 %v4277_v32, %v2758_v4  ;;  %4298 = vrcp.f32 %v2651_v37  ;;  %v2764_v44 = vsub.f32 %v4428_v27, %v4429_v2  ;;  %v4440_v27 = vld [vmem:[%s6091_s1 + $0x68] sm:$0xff] }
 0x1c5   :  { %v4279_v29 = vpop.eup %4278  ;;  %v4083_v49 = vadd.f32 %v2388_v36, %v1330_v26  ;;  %v2835_v13 = vadd.f32 %v4415_v18, %v2797_v3  ;;  %4300 = vpow2.f32 %v2992_v57  ;;  %v2995_v58 = vmul.f32 -1.442695, %v4082_v15  ;;  %v4431_v3 = vld [vmem:[%s6092_s2 + $0x48] sm:$0xff] }
 0x1c6   :  { %v4281_v35 = vpop.eup %4280  ;;  %v2650_v8 = vadd.f32 1.0, %v4279_v29  ;;  %v2834_v16 = vadd.f32 %v4417_v56, %v2796_v24  ;;  %v3578_v14 = vpop.f32.mrb[16].mxu1 }
 0x1c7   :  { %v4283_v10 = vpop.eup %4282  ;;  %v2653_v17 = vadd.f32 1.0, %v4281_v35  ;;  %v2994_v11 = vmul.f32 -1.442695, %v4083_v49  ;;  %v3848_v41 = vpop.f32.mrb[18].mxu0  ;;  %2873 = vst [vmem:[%s6093_s3 + $0x8] sm:$0xff] %v2835_v13  ;;  %v4084_v53 = vadd.f32 %v3845_v38, %v3578_v14 }
 0x1c8   :  { %v4285_v55 = vpop.eup %4284  ;;  %v2799_v61 = vmul.f32 %v4283_v10, %v2761_v52  ;;  %4302 = vrcp.f32 %v2650_v8  ;;  %v1344_v62 = vpop.f32.mrb[17].mxu1  ;;  %2872 = vst [vmem:[%s6093_s3] sm:$0xff] %v2834_v16  ;;  %v4430_v52 = vld [vmem:[%s6091_s1 + $0x48] sm:$0xff]  ;;  %v4432_v16 = vld [vmem:[%s6091_s1 + $0x40] sm:$0xff] }
 0x1c9   :  { %v2412_v34 = vpop.f32.mrb[19].mxu0  ;;  %v4287_v6 = vpop.eup %4286  ;;  %v2798_v22 = vmul.f32 %v4285_v55, %v2760_v9  ;;  %4304 = vrcp.f32 %v2653_v17  ;;  %v4085_v60 = vadd.f32 %v2400_v5, %v1344_v62  ;;  %v2997_v46 = vmul.f32 -1.442695, %v4084_v53  ;;  %v4433_v17 = vld [vmem:[%s6092_s2 + $0x40] sm:$0xff] }
 0x1ca   :  { %v4289_v19 = vpop.eup %4288  ;;  %v2837_v12 = vadd.f32 %v4419_v50, %v2799_v61  ;;  %v2652_v48 = vadd.f32 1.0, %v4287_v6  ;;  %4306 = vpow2.f32 %v2995_v58  ;;  %v3581_v25 = vpop.f32.mrb[18].mxu1  ;;  %v2767_v15 = vsub.f32 %v4430_v52, %v4431_v3 }
 0x1cb   :  { %v4291_v54 = vpop.eup %4290  ;;  %v2836_v39 = vadd.f32 %v4421_v40, %v2798_v22  ;;  %v2655_v45 = vadd.f32 1.0, %v4289_v19  ;;  %4308 = vpow2.f32 %v2994_v11  ;;  %v2996_v0 = vmul.f32 -1.442695, %v4085_v60  ;;  %v3851_v18 = vpop.f32.mrb[20].mxu0 }
 0x1cc   :  { %v4293_v63 = vpop.eup %4292  ;;  %2875 = vst [vmem:[%s6093_s3 + $0x18] sm:$0xff] %v2837_v12  ;;  %v2801_v36 = vmul.f32 %v4291_v54, %v2763_v43  ;;  %4310 = vrcp.f32 %v2652_v48  ;;  %v4086_v51 = vadd.f32 %v3848_v41, %v3581_v25  ;;  %v1358_v56 = vpop.f32.mrb[19].mxu1  ;;  %v2766_v11 = vsub.f32 %v4432_v16, %v4433_v17 }
 0x1cd   :  { %v2424_v4 = vpop.f32.mrb[21].mxu0  ;;  %v4295_v30 = vpop.eup %4294  ;;  %2874 = vst [vmem:[%s6093_s3 + $0x10] sm:$0xff] %v2836_v39  ;;  %v2800_v37 = vmul.f32 %v4293_v63, %v2762_v7  ;;  %4312 = vrcp.f32 %v2655_v45  ;;  %v4087_v57 = vadd.f32 %v2412_v34, %v1358_v56 }
 0x1ce   :  { %v4297_v59 = vpop.eup %4296  ;;  %v2839_v38 = vadd.f32 %v4423_v1, %v2801_v36  ;;  %v2654_v32 = vadd.f32 1.0, %v4295_v30  ;;  %4314 = vpow2.f32 %v2997_v46  ;;  %v2999_v47 = vmul.f32 -1.442695, %v4086_v51  ;;  %v3584_v29 = vpop.f32.mrb[20].mxu1  ;;  %v5810_v1 = vld [vmem:[%s6092_s2 + $0x50] sm:$0xff] }
 0x1cf   :  { %v4299_v50 = vpop.eup %4298  ;;  %v2838_v26 = vadd.f32 %v4425_v33, %v2800_v37  ;;  %v2657_v5 = vadd.f32 1.0, %v4297_v59  ;;  %4316 = vpow2.f32 %v2996_v0  ;;  %v3854_v28 = vpop.f32.mrb[22].mxu0  ;;  %v2998_v24 = vmul.f32 -1.442695, %v4087_v57  ;;  %v4437_v33 = vld [vmem:[%s6092_s2 + $0x58] sm:$0xff] }
 0x1d0   :  { %v4301_v40 = vpop.eup %4300  ;;  %2877 = vst [vmem:[%s6093_s3 + $0x28] sm:$0xff] %v2839_v38  ;;  %v2803_v9 = vmul.f32 %v4299_v50, %v2765_v31  ;;  %4318 = vrcp.f32 %v2654_v32  ;;  %v4088_v49 = vadd.f32 %v3851_v18, %v3584_v29  ;;  %v1372_v35 = vpop.f32.mrb[21].mxu1  ;;  %v2768_v43 = vsub.f32 %v4434_v42, %v5810_v1 }
 0x1d1   :  { %v2436_v13 = vpop.f32.mrb[23].mxu0  ;;  %2876 = vst [vmem:[%s6093_s3 + $0x20] sm:$0xff] %v2838_v26  ;;  %4320 = vrcp.f32 %v2657_v5  ;;  %v2656_v8 = vadd.f32 1.0, %v4301_v40  ;;  %v4089_v58 = vadd.f32 %v2424_v4, %v1372_v35  ;;  %v2769_v7 = vsub.f32 %v4436_v21, %v4437_v33  ;;  %v4442_v35 = vld [vmem:[%s6091_s1 + $0x78] sm:$0xff] }
 0x1d2   :  { %v4303_v10 = vpop.eup %4302  ;;  %v2841_v14 = vadd.f32 %v4427_v23, %v2803_v9  ;;  %4322 = vpow2.f32 %v2999_v47  ;;  %v3001_v41 = vmul.f32 -1.442695, %v4088_v49  ;;  %v3587_v62 = vpop.f32.mrb[22].mxu1  ;;  %v5828_v23 = vld [vmem:[%s6092_s2 + $0x60] sm:$0xff] }
 0x1d3   :  { %v4305_v55 = vpop.eup %4304  ;;  %v2802_v61 = vmul.f32 %v4303_v10, %v2764_v44  ;;  %4324 = vrcp.f32 %v2656_v8  ;;  %v3000_v53 = vmul.f32 -1.442695, %v4089_v58  ;;  %v3857_v34 = vpop.f32.mrb[24].mxu0  ;;  %v4090_v60 = vadd.f32 %v3854_v28, %v3587_v62 }
 0x1d4   :  { %v4307_v6 = vpop.eup %4306  ;;  %2879 = vst [vmem:[%s6093_s3 + $0x38] sm:$0xff] %v2841_v14  ;;  %v2805_v22 = vmul.f32 %v4305_v55, %v2767_v15  ;;  %4326 = vpow2.f32 %v2998_v24  ;;  %v1386_v19 = vpop.f32.mrb[23].mxu1  ;;  %v2770_v31 = vsub.f32 %v4438_v20, %v5828_v23 }
 0x1d5   :  { %v2448_v12 = vpop.f32.mrb[25].mxu0  ;;  %v4309_v48 = vpop.eup %4308  ;;  %v2840_v46 = vadd.f32 %v4429_v2, %v2802_v61  ;;  %v2659_v54 = vadd.f32 1.0, %v4307_v6  ;;  %4328 = vpow2.f32 %v3001_v41  ;;  %v4091_v39 = vadd.f32 %v2436_v13, %v1386_v19  ;;  %v4441_v2 = vld [vmem:[%s6092_s2 + $0x68] sm:$0xff]  ;;  %v4443_v13 = vld [vmem:[%s6092_s2 + $0x78] sm:$0xff]  ;;  %v4445_v6 = vld [vmem:[%s6092_s2 + $0x70] sm:$0xff] }
 0x1d6   :  { %v4311_v45 = vpop.eup %4310  ;;  %v2843_v0 = vadd.f32 %v4431_v3, %v2805_v22  ;;  %v2658_v25 = vadd.f32 1.0, %v4309_v48  ;;  %4330 = vpow2.f32 %v3000_v53  ;;  %v3003_v18 = vmul.f32 -1.442695, %v4090_v60  ;;  %v3590_v56 = vpop.f32.mrb[24].mxu1 }
 0x1d7   :  { %v4313_v63 = vpop.eup %4312  ;;  %2878 = vst [vmem:[%s6093_s3 + $0x30] sm:$0xff] %v2840_v46  ;;  %v2804_v36 = vmul.f32 %v4311_v45, %v2766_v11  ;;  %4332 = vrcp.f32 %v2659_v54  ;;  %v3002_v51 = vmul.f32 -1.442695, %v4091_v39  ;;  %v3860_v4 = vpop.f32.mrb[26].mxu0  ;;  %v2771_v44 = vsub.f32 %v4440_v27, %v4441_v2  ;;  %v4446_v45 = vld [vmem:[%s6091_s1 + $0x80] sm:$0xff]  ;;  %v5892_v27 = vld [vmem:[%s6092_s2 + $0x90] sm:$0xff] }
 0x1d8   :  { %v4315_v30 = vpop.eup %4314  ;;  %2881 = vst [vmem:[%s6093_s3 + $0x48] sm:$0xff] %v2843_v0  ;;  %v2807_v37 = vmul.f32 %v4313_v63, %v2769_v7  ;;  %4334 = vrcp.f32 %v2658_v25  ;;  %v4092_v57 = vadd.f32 %v3857_v34, %v3590_v56  ;;  %v1400_v59 = vpop.f32.mrb[25].mxu1  ;;  %v2773_v8 = vsub.f32 %v4442_v35, %v4443_v13  ;;  %v4444_v34 = vld [vmem:[%s6091_s1 + $0x70] sm:$0xff]  ;;  %v4447_v0 = vld [vmem:[%s6092_s2 + $0x80] sm:$0xff] }
 0x1d9   :  { %v2460_v38 = vpop.f32.mrb[27].mxu0  ;;  %v4317_v32 = vpop.eup %4316  ;;  %v2842_v47 = vadd.f32 %v4433_v17, %v2804_v36  ;;  %v2661_v50 = vadd.f32 1.0, %v4315_v30  ;;  %4336 = vpow2.f32 %v3003_v18  ;;  %v4093_v52 = vadd.f32 %v2448_v12, %v1400_v59  ;;  %v5887_v30 = vld [vmem:[%s6091_s1 + $0x90] sm:$0xff] }
 0x1da   :  { %v4319_v3 = vpop.eup %4318  ;;  %v2845_v15 = vadd.f32 %v4437_v33, %v2807_v37  ;;  %v2660_v26 = vadd.f32 1.0, %v4317_v32  ;;  %4338 = vpow2.f32 %v3002_v51  ;;  %v3005_v5 = vmul.f32 -1.442695, %v4092_v57  ;;  %v3593_v9 = vpop.f32.mrb[26].mxu1 }
 0x1db   :  { %v4321_v29 = vpop.eup %4320  ;;  %2880 = vst [vmem:[%s6093_s3 + $0x40] sm:$0xff] %v2842_v47  ;;  %v2806_v28 = vmul.f32 %v4319_v3, %v2768_v43  ;;  %4340 = vrcp.f32 %v2661_v50  ;;  %v3004_v40 = vmul.f32 -1.442695, %v4093_v52  ;;  %v3863_v24 = vpop.f32.mrb[28].mxu0  ;;  %v4094_v10 = vadd.f32 %v3860_v4, %v3593_v9  ;;  %v4453_v9 = vld [vmem:[%s6092_s2 + $0x98] sm:$0xff] }
 0x1dc   :  { %v4323_v49 = vpop.eup %4322  ;;  %2883 = vst [vmem:[%s6093_s3 + $0x58] sm:$0xff] %v2845_v15  ;;  %v2809_v58 = vmul.f32 %v4321_v29, %v2771_v44  ;;  %4342 = vrcp.f32 %v2660_v26  ;;  %v1414_v16 = vpop.f32.mrb[27].mxu1  ;;  %v2772_v21 = vsub.f32 %v4444_v34, %v4445_v6  ;;  %v2774_v25 = vsub.f32 %v4446_v45, %v4447_v0 }
 0x1dd   :  { %v2472_v17 = vpop.f32.mrb[29].mxu0  ;;  %v4325_v11 = vpop.eup %4324  ;;  %v2844_v14 = vadd.f32 %v5810_v1, %v2806_v28  ;;  %v2663_v41 = vadd.f32 1.0, %v4323_v49  ;;  %4344 = vpow2.f32 %v3005_v5  ;;  %v4095_v55 = vadd.f32 %v2460_v38, %v1414_v16 }
 0x1de   :  { %v4327_v42 = vpop.eup %4326  ;;  %v2847_v43 = vadd.f32 %v4441_v2, %v2809_v58  ;;  %v2808_v61 = vmul.f32 %v4325_v11, %v2770_v31  ;;  %4346 = vpow2.f32 %v3004_v40  ;;  %v3007_v53 = vmul.f32 -1.442695, %v4094_v10  ;;  %v3596_v7 = vpop.f32.mrb[28].mxu1  ;;  %v4449_v31 = vld [vmem:[%s6092_s2 + $0x88] sm:$0xff]  ;;  %v4452_v40 = vld [vmem:[%s6091_s1 + $0x98] sm:$0xff] }
 0x1df   :  { %v4329_v62 = vpop.eup %4328  ;;  %2882 = vst [vmem:[%s6093_s3 + $0x50] sm:$0xff] %v2844_v14  ;;  %4348 = vrcp.f32 %v2663_v41  ;;  %v2662_v1 = vadd.f32 1.0, %v4327_v42  ;;  %v3006_v33 = vmul.f32 -1.442695, %v4095_v55  ;;  %v3866_v22 = vpop.f32.mrb[30].mxu0  ;;  %v4096_v48 = vadd.f32 %v3863_v24, %v3596_v7  ;;  %v4455_v58 = vld [vmem:[%s6092_s2 + $0xa8] sm:$0xff] }
 0x1e0   :  { %v4331_v60 = vpop.eup %4330  ;;  %2885 = vst [vmem:[%s6093_s3 + $0x68] sm:$0xff] %v2847_v43  ;;  %v2846_v19 = vadd.f32 %v5828_v23, %v2808_v61  ;;  %v2665_v12 = vadd.f32 1.0, %v4329_v62  ;;  %4350 = vpow2.f32 %v3007_v53  ;;  %v1428_v46 = vpop.f32.mrb[29].mxu1  ;;  %v4448_v23 = vld [vmem:[%s6091_s1 + $0x88] sm:$0xff]  ;;  %v2776_v2 = vsub.f32 %v5887_v30, %v5892_v27  ;;  %v4457_v7 = vld [vmem:[%s6092_s2 + $0xa0] sm:$0xff] }
 0x1e1   :  { %v2484_v54 = vpop.f32.mrb[31].mxu0  ;;  %v4333_v39 = vpop.eup %4332  ;;  %4352 = vrcp.f32 %v2662_v1  ;;  %v2664_v18 = vadd.f32 1.0, %v4331_v60  ;;  %v4097_v63 = vadd.f32 %v2472_v17, %v1428_v46  ;;  %v2775_v36 = vsub.f32 %v4448_v23, %v4449_v31  ;;  %v5929_v46 = vld [vmem:[%s6092_s2 + $0xb0] sm:$0xff] }
 0x1e2   :  { %v4335_v20 = vpop.eup %4334  ;;  %2884 = vst [vmem:[%s6093_s3 + $0x60] sm:$0xff] %v2846_v19  ;;  %v2811_v51 = vmul.f32 %v4333_v39, %v2773_v8  ;;  %4354 = vrcp.f32 %v2665_v12  ;;  %v3009_v56 = vmul.f32 -1.442695, %v4096_v48  ;;  %v3599_v57 = vpop.f32.mrb[30].mxu1  ;;  %v2777_v24 = vsub.f32 %v4452_v40, %v4453_v9  ;;  %v4454_v8 = vld [vmem:[%s6091_s1 + $0xa8] sm:$0xff]  ;;  %v4458_v48 = vld [vmem:[%s6091_s1 + $0xb0] sm:$0xff] }
 0x1e3   :  { %v4337_v4 = vpop.eup %4336  ;;  %v2810_v44 = vmul.f32 %v4335_v20, %v2772_v21  ;;  %4356 = vrcp.f32 %v2664_v18  ;;  %v3008_v37 = vmul.f32 -1.442695, %v4097_v63  ;;  %v3869_v59 = vpop.f32.mrb[32].mxu0  ;;  %v4098_v50 = vadd.f32 %v3866_v22, %v3599_v57  ;;  %v4462_v40 = vld [vmem:[%s6091_s1 + $0xc8] sm:$0xff] }
 0x1e4   :  { %v4339_v38 = vpop.eup %4338  ;;  %v2849_v32 = vadd.f32 %v4443_v13, %v2811_v51  ;;  %v2667_v47 = vadd.f32 1.0, %v4337_v4  ;;  %4358 = vpow2.f32 %v3006_v33  ;;  %v1442_v52 = vpop.f32.mrb[31].mxu1  ;;  %v2779_v10 = vsub.f32 %v4454_v8, %v4455_v58  ;;  %v4456_v33 = vld [vmem:[%s6091_s1 + $0xa0] sm:$0xff]  ;;  %v4461_v4 = vld [vmem:[%s6092_s2 + $0xb8] sm:$0xff] }
 0x1e5   :  { %v2496_v3 = vpop.f32.mrb[33].mxu0  ;;  %v4341_v15 = vpop.eup %4340  ;;  %v2848_v26 = vadd.f32 %v4445_v6, %v2810_v44  ;;  %v2666_v5 = vadd.f32 1.0, %v4339_v38  ;;  %4360 = vpow2.f32 %v3009_v56  ;;  %v4099_v29 = vadd.f32 %v2484_v54, %v1442_v52  ;;  %v4460_v56 = vld [vmem:[%s6091_s1 + $0xb8] sm:$0xff]  ;;  %v4464_v8 = vld [vmem:[%s6091_s1 + $0xc0] sm:$0xff] }
 0x1e6   :  { %v4343_v28 = vpop.eup %4342  ;;  %2887 = vst [vmem:[%s6093_s3 + $0x78] sm:$0xff] %v2849_v32  ;;  %v2813_v49 = vmul.f32 %v4341_v15, %v2775_v36  ;;  %4362 = vrcp.f32 %v2667_v47  ;;  %v3011_v35 = vmul.f32 -1.442695, %v4098_v50  ;;  %v3602_v11 = vpop.f32.mrb[32].mxu1  ;;  %v2778_v22 = vsub.f32 %v4456_v33, %v4457_v7 }
 0x1e7   :  { %v4345_v13 = vpop.eup %4344  ;;  %2886 = vst [vmem:[%s6093_s3 + $0x70] sm:$0xff] %v2848_v26  ;;  %v2812_v16 = vmul.f32 %v4343_v28, %v2774_v25  ;;  %4364 = vrcp.f32 %v2666_v5  ;;  %v3010_v17 = vmul.f32 -1.442695, %v4099_v29  ;;  %v3872_v14 = vpop.f32.mrb[34].mxu0  ;;  %v4100_v43 = vadd.f32 %v3869_v59, %v3602_v11 }
 0x1e8   :  { %v4347_v41 = vpop.eup %4346  ;;  %v2851_v55 = vadd.f32 %v4449_v31, %v2813_v49  ;;  %v2669_v42 = vadd.f32 1.0, %v4345_v13  ;;  %4366 = vpow2.f32 %v3008_v37  ;;  %v1456_v61 = vpop.f32.mrb[33].mxu1  ;;  %v2780_v54 = vsub.f32 %v4458_v48, %v5929_v46  ;;  %v4469_v48 = vld [vmem:[%s6092_s2 + $0xd0] sm:$0xff] }
 0x1e9   :  { %v2508_v53 = vpop.f32.mrb[35].mxu0  ;;  %v4349_v62 = vpop.eup %4348  ;;  %v2850_v34 = vadd.f32 %v4447_v0, %v2812_v16  ;;  %v2668_v6 = vadd.f32 1.0, %v4347_v41  ;;  %4368 = vpow2.f32 %v3011_v35  ;;  %v4101_v21 = vadd.f32 %v2496_v3, %v1456_v61  ;;  %v4467_v61 = vld [vmem:[%s6092_s2 + $0xd8] sm:$0xff] }
 0x1ea   :  { %v4351_v1 = vpop.eup %4350  ;;  %2889 = vst [vmem:[%s6093_s3 + $0x88] sm:$0xff] %v2851_v55  ;;  %v2815_v60 = vmul.f32 %v4349_v62, %v2777_v24  ;;  %4370 = vrcp.f32 %v2669_v42  ;;  %v3013_v19 = vmul.f32 -1.442695, %v4100_v43  ;;  %v3605_v0 = vpop.f32.mrb[34].mxu1  ;;  %v2781_v44 = vsub.f32 %v4460_v56, %v4461_v4  ;;  %v4466_v43 = vld [vmem:[%s6091_s1 + $0xd8] sm:$0xff] }
 0x1eb   :  { %v4353_v12 = vpop.eup %4352  ;;  %2888 = vst [vmem:[%s6093_s3 + $0x80] sm:$0xff] %v2850_v34  ;;  %4372 = vrcp.f32 %v2668_v6  ;;  %v2671_v39 = vadd.f32 1.0, %v4351_v1  ;;  %v3012_v45 = vmul.f32 -1.442695, %v4101_v21  ;;  %v3875_v25 = vpop.f32.mrb[36].mxu0  ;;  %v4102_v23 = vadd.f32 %v3872_v14, %v3605_v0  ;;  %v4470_v0 = vld [vmem:[%s6091_s1 + $0xe8] sm:$0xff] }
 0x1ec   :  { %v4355_v18 = vpop.eup %4354  ;;  %v2853_v63 = vadd.f32 %v4453_v9, %v2815_v60  ;;  %v2814_v20 = vmul.f32 %v4353_v12, %v2776_v2  ;;  %4374 = vpow2.f32 %v3010_v17  ;;  %v1470_v31 = vpop.f32.mrb[35].mxu1  ;;  %v4463_v9 = vld [vmem:[%s6092_s2 + $0xc8] sm:$0xff]  ;;  %v4468_v12 = vld [vmem:[%s6091_s1 + $0xd0] sm:$0xff] }
 0x1ed   :  { %v2520_v36 = vpop.f32.mrb[37].mxu0  ;;  %v4357_v51 = vpop.eup %4356  ;;  %v2817_v37 = vmul.f32 %v4355_v18, %v2779_v10  ;;  %4376 = vrcp.f32 %v2671_v39  ;;  %v4103_v57 = vadd.f32 %v2508_v53, %v1470_v31  ;;  %v3015_v38 = vmul.f32 -1.442695, %v4102_v23 }
 0x1ee   :  { %v4359_v59 = vpop.eup %4358  ;;  %2891 = vst [vmem:[%s6093_s3 + $0x98] sm:$0xff] %v2853_v63  ;;  %v2852_v30 = vadd.f32 %v5892_v27, %v2814_v20  ;;  %v2816_v2 = vmul.f32 %v4357_v51, %v2778_v22  ;;  %4378 = vpow2.f32 %v3013_v19  ;;  %v3608_v3 = vpop.f32.mrb[36].mxu1  ;;  %v2783_v24 = vsub.f32 %v4462_v40, %v4463_v9 }
 0x1ef   :  { %v4361_v32 = vpop.eup %4360  ;;  %v2855_v47 = vadd.f32 %v4455_v58, %v2817_v37  ;;  %v2670_v50 = vadd.f32 1.0, %v4359_v59  ;;  %4380 = vpow2.f32 %v3012_v45  ;;  %v3014_v52 = vmul.f32 -1.442695, %v4103_v57  ;;  %v1484_v28 = vpop.f32.mrb[37].mxu1  ;;  %v4465_v58 = vld [vmem:[%s6092_s2 + $0xc0] sm:$0xff] }
 0x1f0   :  { %v4363_v15 = vpop.eup %4362  ;;  %2890 = vst [vmem:[%s6093_s3 + $0x90] sm:$0xff] %v2852_v30  ;;  %v2854_v26 = vadd.f32 %v4457_v7, %v2816_v2  ;;  %v2673_v5 = vadd.f32 1.0, %v4361_v32  ;;  %4382 = vpow2.f32 %v3015_v38  ;;  %v4104_v29 = vadd.f32 %v3875_v25, %v3608_v3  ;;  %v4471_v25 = vld [vmem:[%s6092_s2 + $0xe8] sm:$0xff]  ;;  %v4474_v30 = vld [vmem:[%s6091_s1 + $0xf8] sm:$0xff] }
 0x1f1   :  { %v4365_v27 = vpop.eup %4364  ;;  %2893 = vst [vmem:[%s6093_s3 + $0xa8] sm:$0xff] %v2855_v47  ;;  %v2819_v49 = vmul.f32 %v4363_v15, %v2781_v44  ;;  %4384 = vrcp.f32 %v2670_v50  ;;  %v4105_v35 = vadd.f32 %v2520_v36, %v1484_v28  ;;  %v2782_v10 = vsub.f32 %v4464_v8, %v4465_v58  ;;  %v4473_v44 = vld [vmem:[%s6092_s2 + $0xe0] sm:$0xff]  ;;  %v4475_v2 = vld [vmem:[%s6092_s2 + $0xf8] sm:$0xff]  ;;  %v4477_v28 = vld [vmem:[%s6092_s2 + $0xf0] sm:$0xff] }
 0x1f2   :  { %v4367_v13 = vpop.eup %4366  ;;  %2892 = vst [vmem:[%s6093_s3 + $0xa0] sm:$0xff] %v2854_v26  ;;  %v2818_v16 = vmul.f32 %v4365_v27, %v2780_v54  ;;  %4386 = vrcp.f32 %v2673_v5  ;;  %v3017_v17 = vmul.f32 -1.442695, %v4104_v29  ;;  %v2785_v53 = vsub.f32 %v4466_v43, %v4467_v61  ;;  %v4476_v29 = vld [vmem:[%s6091_s1 + $0xf0] sm:$0xff] }
 0x1f3   :  { %v4369_v11 = vpop.eup %4368  ;;  %v2857_v14 = vadd.f32 %v4461_v4, %v2819_v49  ;;  %v2672_v41 = vadd.f32 1.0, %v4367_v13  ;;  %4388 = vpow2.f32 %v3014_v52  ;;  %v3016_v55 = vmul.f32 -1.442695, %v4105_v35  ;;  %v4472_v4 = vld [vmem:[%s6091_s1 + $0xe0] sm:$0xff]  ;;  %v4478_v49 = vld [vmem:[%s6091_s1 + $0x108] sm:$0xff] }
 0x1f4   :  { %v4371_v42 = vpop.eup %4370  ;;  %v2856_v62 = vadd.f32 %v5929_v46, %v2818_v16  ;;  %v2675_v34 = vadd.f32 1.0, %v4369_v11  ;;  %4390 = vpow2.f32 %v3017_v17  ;;  %v2784_v46 = vsub.f32 %v4468_v12, %v4469_v48  ;;  %v4479_v35 = vld [vmem:[%s6092_s2 + $0x108] sm:$0xff]  ;;  %v4480_v16 = vld [vmem:[%s6091_s1 + $0x100] sm:$0xff] }
 0x1f5   :  { %v4373_v6 = vpop.eup %4372  ;;  %2895 = vst [vmem:[%s6093_s3 + $0xb8] sm:$0xff] %v2857_v14  ;;  %v2821_v21 = vmul.f32 %v4371_v42, %v2783_v24  ;;  %4392 = vrcp.f32 %v2672_v41  ;;  %v2787_v18 = vsub.f32 %v4470_v0, %v4471_v25  ;;  %v2786_v37 = vsub.f32 %v4472_v4, %v4473_v44  ;;  %v4481_v17 = vld [vmem:[%s6092_s2 + $0x100] sm:$0xff]  ;;  %v4482_v41 = vld [vmem:[%s6091_s1 + $0x118] sm:$0xff] }
 0x1f6   :  { %v4375_v1 = vpop.eup %4374  ;;  %2894 = vst [vmem:[%s6093_s3 + $0xb0] sm:$0xff] %v2856_v62  ;;  %v2820_v33 = vmul.f32 %v4373_v6, %v2782_v10  ;;  %4394 = vrcp.f32 %v2675_v34  ;;  %v2789_v38 = vsub.f32 %v4474_v30, %v4475_v2  ;;  %v2788_v27 = vsub.f32 %v4476_v29, %v4477_v28  ;;  %v4488_v0 = vld [vmem:[%s6091_s1 + $0x120] sm:$0xff] }
 0x1f7   :  { %v4377_v7 = vpop.eup %4376  ;;  %v2859_v22 = vadd.f32 %v4463_v9, %v2821_v21  ;;  %v2674_v60 = vadd.f32 1.0, %v4375_v1  ;;  %4396 = vpow2.f32 %v3016_v55  ;;  %v2791_v13 = vsub.f32 %v4478_v49, %v4479_v35  ;;  %v4483_v55 = vld [vmem:[%s6092_s2 + $0x118] sm:$0xff]  ;;  %v4484_v21 = vld [vmem:[%s6091_s1 + $0x110] sm:$0xff] }
 0x1f8   :  { %v4379_v19 = vpop.eup %4378  ;;  %v2858_v54 = vadd.f32 %v4465_v58, %v2820_v33  ;;  %v2823_v39 = vmul.f32 %v4377_v7, %v2785_v53  ;;  %v2790_v11 = vsub.f32 %v4480_v16, %v4481_v17  ;;  %v2793_v42 = vsub.f32 %v4482_v41, %v4483_v55  ;;  %v4485_v1 = vld [vmem:[%s6092_s2 + $0x110] sm:$0xff] }
 0x1f9   :  { %v4381_v45 = vpop.eup %4380  ;;  %2897 = vst [vmem:[%s6093_s3 + $0xc8] sm:$0xff] %v2859_v22  ;;  %4398 = vrcp.f32 %v2674_v60  ;;  %v2677_v63 = vadd.f32 1.0, %v4379_v19  ;;  %v2792_v33 = vsub.f32 %v4484_v21, %v4485_v1  ;;  %v4486_v22 = vld [vmem:[%s6091_s1 + $0x128] sm:$0x7f] }
 0x1fa   :  { %v4383_v20 = vpop.eup %4382  ;;  %2896 = vst [vmem:[%s6093_s3 + $0xc0] sm:$0xff] %v2858_v54  ;;  %v2861_v23 = vadd.f32 %v4467_v61, %v2823_v39  ;;  %v2676_v31 = vadd.f32 1.0, %v4381_v45  ;;  %v4487_v60 = vld [vmem:[%s6092_s2 + $0x128] sm:$0x7f] }
 0x1fb   :  { %v4385_v36 = vpop.eup %4384  ;;  %4400 = vrcp.f32 %v2677_v63  ;;  %v2679_v51 = vadd.f32 1.0, %v4383_v20  ;;  %v2795_v19 = vsub.f32 %v4486_v22, %v4487_v60 }
 0x1fc   :  { %v4387_v56 = vpop.eup %4386  ;;  %2899 = vst [vmem:[%s6093_s3 + $0xd8] sm:$0xff] %v2861_v23  ;;  %v2822_v57 = vmul.f32 %v4385_v36, %v2784_v46  ;;  %4402 = vrcp.f32 %v2676_v31 }
 0x1fd   :  { %v4389_v59 = vpop.eup %4388  ;;  %v2825_v32 = vmul.f32 %v4387_v56, %v2787_v18  ;;  %4404 = vrcp.f32 %v2679_v51 }
 0x1fe   :  { %v4391_v47 = vpop.eup %4390  ;;  %v2860_v50 = vadd.f32 %v4469_v48, %v2822_v57  ;;  %v2678_v52 = vadd.f32 1.0, %v4389_v59 }
 0x1ff   :  { %v4393_v3 = vpop.eup %4392  ;;  %v2863_v15 = vadd.f32 %v4471_v25, %v2825_v32  ;;  %v2681_v26 = vadd.f32 1.0, %v4391_v47  ;;  %v4489_v25 = vld [vmem:[%s6092_s2 + $0x120] sm:$0xff] }
 0x200   :  { %v4395_v5 = vpop.eup %4394  ;;  %2898 = vst [vmem:[%s6093_s3 + $0xd0] sm:$0xff] %v2860_v50  ;;  %v2824_v40 = vmul.f32 %v4393_v3, %v2786_v37  ;;  %4406 = vrcp.f32 %v2678_v52  ;;  %v2794_v18 = vsub.f32 %v4488_v0, %v4489_v25 }
 0x201   :  { %v4397_v9 = vpop.eup %4396  ;;  %2901 = vst [vmem:[%s6093_s3 + $0xe8] sm:$0xff] %v2863_v15  ;;  %v2827_v24 = vmul.f32 %v4395_v5, %v2789_v38  ;;  %4408 = vrcp.f32 %v2681_v26 }
 0x202   :  { %v2862_v8 = vadd.f32 %v4473_v44, %v2824_v40  ;;  %v2680_v58 = vadd.f32 1.0, %v4397_v9 }
 0x203   :  { %v4399_v10 = vpop.eup %4398  ;;  %v2865_v14 = vadd.f32 %v4475_v2, %v2827_v24 }
 0x204   :  { %2900 = vst [vmem:[%s6093_s3 + $0xe0] sm:$0xff] %v2862_v8  ;;  %v2826_v43 = vmul.f32 %v4399_v10, %v2788_v27  ;;  %4410 = vrcp.f32 %v2680_v58 }
 0x205   :  { %v4401_v61 = vpop.eup %4400  ;;  %2903 = vst [vmem:[%s6093_s3 + $0xf8] sm:$0xff] %v2865_v14 }
 0x206   :  { %v4403_v53 = vpop.eup %4402  ;;  %v2864_v62 = vadd.f32 %v4477_v28, %v2826_v43  ;;  %v2829_v34 = vmul.f32 %v4401_v61, %v2791_v13 }
 0x207   :  { %v4405_v6 = vpop.eup %4404  ;;  %v2828_v7 = vmul.f32 %v4403_v53, %v2790_v11 }
 0x208   :  { %2902 = vst [vmem:[%s6093_s3 + $0xf0] sm:$0xff] %v2864_v62  ;;  %v2867_v12 = vadd.f32 %v4479_v35, %v2829_v34  ;;  %v2831_v48 = vmul.f32 %v4405_v6, %v2793_v42 }
 0x209   :  { %v2866_v46 = vadd.f32 %v4481_v17, %v2828_v7 }
 0x20a   :  { %v4407_v54 = vpop.eup %4406  ;;  %2905 = vst [vmem:[%s6093_s3 + $0x108] sm:$0xff] %v2867_v12  ;;  %v2869_v39 = vadd.f32 %v4483_v55, %v2831_v48 }
 0x20b   :  { %v4409_v45 = vpop.eup %4408  ;;  %2904 = vst [vmem:[%s6093_s3 + $0x100] sm:$0xff] %v2866_v46  ;;  %v2830_v63 = vmul.f32 %v4407_v54, %v2792_v33 }
 0x20c   :  { %2907 = vst [vmem:[%s6093_s3 + $0x118] sm:$0xff] %v2869_v39  ;;  %v2833_v20 = vmul.f32 %v4409_v45, %v2795_v19 }
 0x20d   :  { %v2868_v23 = vadd.f32 %v4485_v1, %v2830_v63 }
 0x20e   :  { %v4411_v31 = vpop.eup %4410  ;;  %v2871_v36 = vadd.f32 %v4487_v60, %v2833_v20 }
 0x20f   :  { %2906 = vst [vmem:[%s6093_s3 + $0x110] sm:$0xff] %v2868_v23  ;;  %v2832_v51 = vmul.f32 %v4411_v31, %v2794_v18 }
 0x210   :  { %2909 = vst [vmem:[%s6093_s3 + $0x128] sm:$0x7f] %v2871_v36 }
 0x211   :  { %v2870_v56 = vadd.f32 %v4489_v25, %v2832_v51 }
 0x213   :  { %2908 = vst [vmem:[%s6093_s3 + $0x120] sm:$0xff] %v2870_v56 }

</bundles_post_ra>
